<compile_context>
chip_gen: v5e
topology: v5e:2x2
jax: 0.10.0
libtpu: 0.0.40
codegen_flags: <defaults>
</compile_context>

<pallas_src>
import functools
import math

import jax
import jax.numpy as jnp
from jax.experimental import pallas as pl
from jax.experimental.pallas import tpu as pltpu


def _layernorm(x, gamma, beta, eps=1e-5):
    """LayerNorm in fp32 (matches CLIP's fp16-safe LayerNorm subclass)."""
    xf = x.astype(jnp.float32)
    mu = jnp.mean(xf, axis=-1, keepdims=True)
    var = jnp.mean((xf - mu) ** 2, axis=-1, keepdims=True)
    return (xf - mu) * jax.lax.rsqrt(var + eps) * gamma + beta


def resblock_stack_kernel(x_ref, mask_ref,
                          ln1_g, ln1_b, wqkv, bqkv, wo, bo,
                          ln2_g, ln2_b, wfc, bfc, wproj, bproj,
                          out_ref, x_acc, qkv_acc, ctx_acc,
                          *, n_head, has_mask):
    """One grid step == one residual block (layer l) applied to Bt batch rows.

    Grid is (B//Bt, L); the layer axis is trailing & 'arbitrary', so per-layer
    weight blocks are pipeline-prefetched while the running activation stays
    resident in the x_acc VMEM scratch.
    """
    l = pl.program_id(1)
    Bt, S, D = out_ref.shape
    M = Bt * S
    hd = D // n_head
    bf16 = jnp.bfloat16

    @pl.when(l == 0)
    def _init():
        x_acc[...] = x_ref[...].reshape(M, D).astype(jnp.float32)

    x = x_acc[...]                                              # (M, D) f32

    # ---------------- attention branch ----------------
    h1 = _layernorm(x, ln1_g[0], ln1_b[0]).astype(bf16)         # (M, D) bf16

    # Fused QKV projection: one dense (M, D) @ (D, 3D) MXU matmul.
    # q-scale (hd**-0.5) and q-bias are folded into wqkv / bqkv at pack time.
    qkv = jnp.dot(h1, wqkv[0], preferred_element_type=jnp.float32) + bqkv[0]
    qkv_acc[...] = qkv.reshape(Bt, S, 3 * D)                    # (Bt, S, 3D) f32

    if has_mask:
        mask = mask_ref[...]                                    # (S, S) f32

    # Per-head scores / softmax / ctx, batched over the Bt rows.  The head
    # loop is a static unroll; q/k/v per head come from lane-slices of the
    # VMEM scratch (no value transposes, no LHS replication).
    for h in range(n_head):
        qh = qkv_acc[:, :, h * hd:(h + 1) * hd]                 # (Bt, S, hd), pre-scaled
        kh = qkv_acc[:, :, D + h * hd:D + (h + 1) * hd]
        vh = qkv_acc[:, :, 2 * D + h * hd:2 * D + (h + 1) * hd]

        s = jnp.einsum('bqd,bkd->bqk', qh.astype(bf16), kh.astype(bf16),
                       preferred_element_type=jnp.float32)      # (Bt, S, S)
        if has_mask:
            s = s + mask[None]
        s = s - jnp.max(s, axis=-1, keepdims=True)
        p = jnp.exp(s)
        p = p * pl.reciprocal(jnp.sum(p, axis=-1, keepdims=True), approx=True)

        ctx_acc[:, :, h * hd:(h + 1) * hd] = jnp.einsum(
            'bqk,bkd->bqd', p.astype(bf16), vh.astype(bf16),
            preferred_element_type=jnp.float32)                 # (Bt, S, hd)

    # Heads merged by layout -> one dense (M, D) @ (D, D) output projection.
    ctx = ctx_acc[...].reshape(M, D).astype(bf16)
    attn = jnp.dot(ctx, wo[0], preferred_element_type=jnp.float32) + bo[0]
    x = x + attn

    # ---------------- MLP branch ----------------
    h2 = _layernorm(x, ln2_g[0], ln2_b[0]).astype(bf16)
    fc = jnp.dot(h2, wfc[0], preferred_element_type=jnp.float32) + bfc[0]   # (M, 4D)
    fc = fc * jax.nn.sigmoid(1.702 * fc)                                    # QuickGELU (f32)
    proj = jnp.dot(fc.astype(bf16), wproj[0],
                   preferred_element_type=jnp.float32) + bproj[0]
    x = x + proj

    x_acc[...] = x

    @pl.when(l == pl.num_programs(1) - 1)
    def _write():
        out_ref[...] = x.reshape(Bt, S, D).astype(out_ref.dtype)


def _vmem_limit_bytes(stacked_params, Bt, S, D, n_head):
    """Size the VMEM request from the real working set, clamped to device capacity."""
    M = Bt * S
    # Per-layer parameter block bytes (pipeline double-buffers the layer axis).
    per_layer = sum(math.prod(p.shape[1:]) * p.dtype.itemsize for p in stacked_params)
    # f32 temporaries / scratch live within one layer step (generous bound).
    acts = 4 * (2 * M * D            # x_acc + residual temp
                + M * 3 * D          # qkv matmul result
                + Bt * S * 3 * D     # qkv scratch
                + Bt * S * D         # ctx scratch
                + 2 * Bt * S * S     # scores + probs (one head live at a time)
                + 2 * M * 4 * D)     # fc / gelu
    io = 2 * 2 * M * D * 4           # x / out blocks, double-buffered
    need = 2 * per_layer + acts + io

    cap = 64 * 2 ** 20
    try:
        cap = int(getattr(pltpu.get_tpu_info(), "vmem_capacity_bytes", cap))
    except Exception:
        pass
    budget = max(16 * 2 ** 20, cap - 8 * 2 ** 20)   # leave headroom for the compiler
    return int(max(16 * 2 ** 20, min(budget, int(need * 1.3))))


def transformer_forward(x_sbd, stacked_params, n_head, attn_mask=None, block_b=None):
    """x_sbd: (S, B, D) -- same seq-first convention as the PyTorch Transformer."""
    S, B, D = x_sbd.shape
    L = stacked_params[0].shape[0]
    assert D % n_head == 0
    assert S % 8 == 0, "pad the sequence to a multiple of 8 on the host"

    has_mask = attn_mask is not None
    mask = (attn_mask.astype(jnp.float32) if has_mask
            else jnp.zeros((S, S), jnp.float32))

    # Pick a batch block so each grid step amortizes the layer-weight DMA over
    # Bt rows and the matmul M dim is ~>= 256 rows (roofline / MXU occupancy).
    if block_b is None:
        Bt = min(B, max(1, -(-256 // S)))
        while B % Bt:
            Bt -= 1
    else:
        Bt = block_b
    assert B % Bt == 0

    # One cheap HBM relayout per forward (amortized over L fused layers).
    x_bsd = jnp.transpose(x_sbd, (1, 0, 2))    # (B, S, D)

    def _param_spec(p):
        nrest = p.ndim - 1
        return pl.BlockSpec((1,) + p.shape[1:],
                            lambda b, l, _n=nrest: (l,) + (0,) * _n)

    in_specs = [pl.BlockSpec((Bt, S, D), lambda b, l: (b, 0, 0)),
                pl.BlockSpec((S, S), lambda b, l: (0, 0))]
    in_specs += [_param_spec(p) for p in stacked_params]

    kernel = functools.partial(resblock_stack_kernel,
                               n_head=n_head, has_mask=has_mask)

    out_bsd = pl.pallas_call(
        kernel,
        out_shape=jax.ShapeDtypeStruct((B, S, D), x_bsd.dtype),
        grid_spec=pltpu.PrefetchScalarGridSpec(
            num_scalar_prefetch=0,
            grid=(B // Bt, L),
            in_specs=in_specs,
            out_specs=pl.BlockSpec((Bt, S, D), lambda b, l: (b, 0, 0)),
            scratch_shapes=[pltpu.VMEM((Bt * S, D), jnp.float32),     # running activation
                            pltpu.VMEM((Bt, S, 3 * D), jnp.float32),  # fused qkv
                            pltpu.VMEM((Bt, S, D), jnp.float32)],     # merged-head ctx
        ),
        compiler_params=pltpu.CompilerParams(
            dimension_semantics=("parallel", "arbitrary"),
            vmem_limit_bytes=_vmem_limit_bytes(stacked_params, Bt, S, D, n_head)),
    )(x_bsd, mask, *stacked_params)

    return jnp.transpose(out_bsd, (1, 0, 2))   # back to (S, B, D)


def init_torch_like_params(key, width, layers):
    """Deterministic synthetic parameters in the PyTorch module's native shapes."""
    D = width
    params = []
    for layer in range(layers):
        k = jax.random.fold_in(key, layer)
        ks = jax.random.split(k, 4)
        s = 0.02
        params.append(dict(
            ln1_w=jnp.ones((D,), jnp.float32),
            ln1_b=jnp.zeros((D,), jnp.float32),
            in_proj_w=s * jax.random.normal(ks[0], (3 * D, D), jnp.float32),
            in_proj_b=0.01 * jnp.arange(3 * D, dtype=jnp.float32) / (3 * D),
            out_proj_w=s * jax.random.normal(ks[1], (D, D), jnp.float32),
            out_proj_b=jnp.zeros((D,), jnp.float32),
            ln2_w=jnp.ones((D,), jnp.float32),
            ln2_b=jnp.zeros((D,), jnp.float32),
            fc_w=s * jax.random.normal(ks[2], (4 * D, D), jnp.float32),
            fc_b=jnp.zeros((4 * D,), jnp.float32),
            proj_w=s * jax.random.normal(ks[3], (D, 4 * D), jnp.float32),
            proj_b=jnp.zeros((D,), jnp.float32),
        ))
    return params


def pack_params(torch_params, n_head):
    """Stack per-layer params into (L, ...) arrays in the kernel's layout.

    * QKV weights fused into a single (D, 3D) bf16 matrix with the attention
      scale (hd**-0.5) folded into the q columns; QKV biases fused into one
      lane-dense (1, 3D) f32 row (q part pre-scaled).
    * Out-proj / MLP weights transposed to (in, out) bf16.  LayerNorm params
      and all biases stay f32.  Exact reshapes of the PyTorch weights.
    """
    D = torch_params[0]['ln1_w'].shape[0]
    hd = D // n_head
    scale = hd ** -0.5
    bf16 = jnp.bfloat16

    def stack(fn):
        return jnp.stack([fn(p) for p in torch_params], axis=0)

    ln1_g = stack(lambda p: p['ln1_w'].reshape(1, D))
    ln1_b = stack(lambda p: p['ln1_b'].reshape(1, D))

    def _wqkv(p):
        w = p['in_proj_w']                           # (3D, D): rows ordered q, k, v
        wq = w[:D] * scale
        return jnp.concatenate([wq, w[D:]], axis=0).T.astype(bf16)   # (D, 3D)

    def _bqkv(p):
        b = p['in_proj_b']
        return jnp.concatenate([b[:D] * scale, b[D:]], axis=0).reshape(1, 3 * D)

    wqkv = stack(_wqkv)
    bqkv = stack(_bqkv)
    wo = stack(lambda p: p['out_proj_w'].T.astype(bf16))     # (D, D)
    bo = stack(lambda p: p['out_proj_b'].reshape(1, D))
    ln2_g = stack(lambda p: p['ln2_w'].reshape(1, D))
    ln2_b = stack(lambda p: p['ln2_b'].reshape(1, D))
    wfc = stack(lambda p: p['fc_w'].T.astype(bf16))          # (D, 4D)
    bfc = stack(lambda p: p['fc_b'].reshape(1, 4 * D))
    wproj = stack(lambda p: p['proj_w'].T.astype(bf16))      # (4D, D)
    bproj = stack(lambda p: p['proj_b'].reshape(1, D))
    return (ln1_g, ln1_b, wqkv, bqkv, wo, bo,
            ln2_g, ln2_b, wfc, bfc, wproj, bproj)


def _reference_forward(x_sbd, torch_params, n_head, attn_mask=None):
    """Pure-JAX f32 reference matching the PyTorch module."""
    S, B, D = x_sbd.shape
    H = n_head
    hd = D // H
    x = jnp.transpose(x_sbd, (1, 0, 2)).astype(jnp.float32)   # (B, S, D)

    def ln(v, g, b, eps=1e-5):
        mu = v.mean(-1, keepdims=True)
        var = ((v - mu) ** 2).mean(-1, keepdims=True)
        return (v - mu) * jax.lax.rsqrt(var + eps) * g + b

    for p in torch_params:
        h = ln(x, p['ln1_w'], p['ln1_b'])
        qkv = h @ p['in_proj_w'].T + p['in_proj_b']
        q, k, v = jnp.split(qkv, 3, axis=-1)
        q = q.reshape(B, S, H, hd).transpose(0, 2, 1, 3) * (hd ** -0.5)
        k = k.reshape(B, S, H, hd).transpose(0, 2, 1, 3)
        v = v.reshape(B, S, H, hd).transpose(0, 2, 1, 3)
        s = jnp.einsum('bhqd,bhkd->bhqk', q, k)
        if attn_mask is not None:
            s = s + attn_mask
        w = jax.nn.softmax(s, axis=-1)
        ctx = jnp.einsum('bhqk,bhkd->bhqd', w, v).transpose(0, 2, 1, 3).reshape(B, S, D)
        x = x + ctx @ p['out_proj_w'].T + p['out_proj_b']
        h2 = ln(x, p['ln2_w'], p['ln2_b'])
        fc = h2 @ p['fc_w'].T + p['fc_b']
        fc = fc * jax.nn.sigmoid(1.702 * fc)
        x = x + fc @ p['proj_w'].T + p['proj_b']
    return jnp.transpose(x, (1, 0, 2))


if __name__ == "__main__":
    # Small shapes consistent with Transformer(width=32, layers=2, heads=4).
    S, B, D, H, L = 8, 4, 32, 4, 2

    key = jax.random.PRNGKey(0)
    kx, kp = jax.random.split(key)
    x = jax.random.normal(kx, (S, B, D), jnp.float32)

    torch_like = init_torch_like_params(kp, width=D, layers=L)
    packed = pack_params(torch_like, n_head=H)

    out = transformer_forward(x, packed, n_head=H, attn_mask=None, block_b=2)
    out = jax.block_until_ready(out)
    assert out.shape == (S, B, D)
    assert bool(jnp.all(jnp.isfinite(out)))

    # Loose check vs. the pure-JAX f32 reference (bf16 weights + approx recip).
    ref = _reference_forward(x, torch_like, n_head=H, attn_mask=None)
    max_err = float(jnp.max(jnp.abs(out - ref)))
    assert max_err < 5e-2, f"max abs diff vs reference too large: {max_err}"

    print("KERNEL_OK")
</pallas_src>

<mosaic_0001>
module attributes {stable_mosaic.version = 11 : i64} {
  func.func @resblock_stack_kernel(%arg0: i32, %arg1: i32, %arg2: memref<2x8x32xf32, #tpu.memory_space<vmem>>, %arg3: memref<8x8xf32, #tpu.memory_space<vmem>>, %arg4: memref<1x1x32xf32, #tpu.memory_space<vmem>>, %arg5: memref<1x1x32xf32, #tpu.memory_space<vmem>>, %arg6: memref<1x32x96xbf16, #tpu.memory_space<vmem>>, %arg7: memref<1x1x96xf32, #tpu.memory_space<vmem>>, %arg8: memref<1x32x32xbf16, #tpu.memory_space<vmem>>, %arg9: memref<1x1x32xf32, #tpu.memory_space<vmem>>, %arg10: memref<1x1x32xf32, #tpu.memory_space<vmem>>, %arg11: memref<1x1x32xf32, #tpu.memory_space<vmem>>, %arg12: memref<1x32x128xbf16, #tpu.memory_space<vmem>>, %arg13: memref<1x1x128xf32, #tpu.memory_space<vmem>>, %arg14: memref<1x128x32xbf16, #tpu.memory_space<vmem>>, %arg15: memref<1x1x32xf32, #tpu.memory_space<vmem>>, %arg16: memref<2x8x32xf32, #tpu.memory_space<vmem>>, %arg17: memref<16x32xf32, #tpu.memory_space<vmem>>, %arg18: memref<2x8x96xf32, #tpu.memory_space<vmem>>, %arg19: memref<2x8x32xf32, #tpu.memory_space<vmem>>) attributes {dimension_semantics = [#tpu.dimension_semantics<parallel>, #tpu.dimension_semantics<arbitrary>], iteration_bounds = array<i64: 2, 2>, scalar_prefetch = 0 : i64, scratch_operands = 3 : i64, tpu.core_type = #tpu.core_type<tc>, window_params = [{transform_indices = @transform_0, window_bounds = array<i64: 2, 8, 32>}, {pipeline_mode = #tpu.pipeline_mode<synchronous>, transform_indices = @transform_1, window_bounds = array<i64: 8, 8>}, {transform_indices = @transform_2, window_bounds = array<i64: 1, 1, 32>}, {transform_indices = @transform_3, window_bounds = array<i64: 1, 1, 32>}, {transform_indices = @transform_4, window_bounds = array<i64: 1, 32, 96>}, {transform_indices = @transform_5, window_bounds = array<i64: 1, 1, 96>}, {transform_indices = @transform_6, window_bounds = array<i64: 1, 32, 32>}, {transform_indices = @transform_7, window_bounds = array<i64: 1, 1, 32>}, {transform_indices = @transform_8, window_bounds = array<i64: 1, 1, 32>}, {transform_indices = @transform_9, window_bounds = array<i64: 1, 1, 32>}, {transform_indices = @transform_10, window_bounds = array<i64: 1, 32, 128>}, {transform_indices = @transform_11, window_bounds = array<i64: 1, 1, 128>}, {transform_indices = @transform_12, window_bounds = array<i64: 1, 128, 32>}, {transform_indices = @transform_13, window_bounds = array<i64: 1, 1, 32>}, {transform_indices = @transform_14, window_bounds = array<i64: 2, 8, 32>}]} {
    %c0_i32 = arith.constant 0 : i32
    %0 = arith.cmpi eq, %arg1, %c0_i32 : i32
    %1 = arith.extui %0 : i1 to i32
    %c0_i32_0 = arith.constant 0 : i32
    %2 = arith.cmpi ne, %1, %c0_i32_0 : i32
    scf.if %2 {
      %c0_115 = arith.constant 0 : index
      %c0_116 = arith.constant 0 : index
      %c0_117 = arith.constant 0 : index
      %186 = vector.load %arg2[%c0_115, %c0_116, %c0_117] : memref<2x8x32xf32, #tpu.memory_space<vmem>>, vector<2x8x32xf32>
      %187 = vector.shape_cast %186 : vector<2x8x32xf32> to vector<16x32xf32>
      %c0_118 = arith.constant 0 : index
      %c0_119 = arith.constant 0 : index
      %188 = vector.load %arg17[%c0_118, %c0_119] : memref<16x32xf32, #tpu.memory_space<vmem>>, vector<16x32xf32>
      tpu.vector_store %arg17[%c0_118, %c0_119], %187 {strides = array<i32>} : memref<16x32xf32, #tpu.memory_space<vmem>>, vector<16x32xf32>,
    } else {
    }
    %c0 = arith.constant 0 : index
    %c0_1 = arith.constant 0 : index
    %3 = vector.load %arg17[%c0, %c0_1] : memref<16x32xf32, #tpu.memory_space<vmem>>, vector<16x32xf32>
    %c0_2 = arith.constant 0 : index
    %c0_3 = arith.constant 0 : index
    %c0_4 = arith.constant 0 : index
    %4 = vector.load %arg4[%c0_2, %c0_3, %c0_4] : memref<1x1x32xf32, #tpu.memory_space<vmem>>, vector<1x1x32xf32>
    %5 = vector.shape_cast %4 : vector<1x1x32xf32> to vector<1x32xf32>
    %c0_5 = arith.constant 0 : index
    %c0_6 = arith.constant 0 : index
    %c0_7 = arith.constant 0 : index
    %6 = vector.load %arg5[%c0_5, %c0_6, %c0_7] : memref<1x1x32xf32, #tpu.memory_space<vmem>>, vector<1x1x32xf32>
    %7 = vector.shape_cast %6 : vector<1x1x32xf32> to vector<1x32xf32>
    %cst = arith.constant dense<0.000000e+00> : vector<16xf32>
    %8 = vector.multi_reduction <add>, %3, %cst [1] : vector<16x32xf32> to vector<16xf32>
    %9 = vector.shape_cast %8 : vector<16xf32> to vector<16x1xf32>
    %cst_8 = arith.constant 3.200000e+01 : f32
    %10 = vector.broadcast %cst_8 : f32 to vector<16x1xf32>
    %11 = arith.divf %9, %10 : vector<16x1xf32>
    %12 = vector.broadcast %11 : vector<16x1xf32> to vector<16x32xf32>
    %13 = arith.subf %3, %12 : vector<16x32xf32>
    %14 = arith.mulf %13, %13 : vector<16x32xf32>
    %cst_9 = arith.constant dense<0.000000e+00> : vector<16xf32>
    %15 = vector.multi_reduction <add>, %14, %cst_9 [1] : vector<16x32xf32> to vector<16xf32>
    %16 = vector.shape_cast %15 : vector<16xf32> to vector<16x1xf32>
    %cst_10 = arith.constant 3.200000e+01 : f32
    %17 = vector.broadcast %cst_10 : f32 to vector<16x1xf32>
    %18 = arith.divf %16, %17 : vector<16x1xf32>
    %19 = vector.broadcast %11 : vector<16x1xf32> to vector<16x32xf32>
    %20 = arith.subf %3, %19 : vector<16x32xf32>
    %cst_11 = arith.constant 9.99999974E-6 : f32
    %21 = vector.broadcast %cst_11 : f32 to vector<16x1xf32>
    %22 = arith.addf %18, %21 : vector<16x1xf32>
    %23 = math.rsqrt %22 : vector<16x1xf32>
    %24 = vector.broadcast %23 : vector<16x1xf32> to vector<16x32xf32>
    %25 = arith.mulf %20, %24 : vector<16x32xf32>
    %26 = vector.broadcast %5 : vector<1x32xf32> to vector<16x32xf32>
    %27 = arith.mulf %25, %26 : vector<16x32xf32>
    %28 = vector.broadcast %7 : vector<1x32xf32> to vector<16x32xf32>
    %29 = arith.addf %27, %28 : vector<16x32xf32>
    %30 = arith.truncf %29 : vector<16x32xf32> to vector<16x32xbf16>
    %c0_12 = arith.constant 0 : index
    %c0_13 = arith.constant 0 : index
    %c0_14 = arith.constant 0 : index
    %31 = vector.load %arg6[%c0_12, %c0_13, %c0_14] : memref<1x32x96xbf16, #tpu.memory_space<vmem>>, vector<1x32x96xbf16>
    %32 = vector.shape_cast %31 : vector<1x32x96xbf16> to vector<32x96xbf16>
    %cst_15 = arith.constant dense<0.000000e+00> : vector<16x96xf32>
    %33 = tpu.matmul %30, %32, %cst_15 {dimension_numbers = #tpu.dot_dimension_numbers<[1], [0], [0], [1], [0, 0, 1, 1], [], []>} : vector<16x32xbf16>, vector<32x96xbf16>, vector<16x96xf32> -> vector<16x96xf32>
    %c0_16 = arith.constant 0 : index
    %c0_17 = arith.constant 0 : index
    %c0_18 = arith.constant 0 : index
    %34 = vector.load %arg7[%c0_16, %c0_17, %c0_18] : memref<1x1x96xf32, #tpu.memory_space<vmem>>, vector<1x1x96xf32>
    %35 = vector.shape_cast %34 : vector<1x1x96xf32> to vector<1x96xf32>
    %36 = vector.broadcast %35 : vector<1x96xf32> to vector<16x96xf32>
    %37 = arith.addf %33, %36 : vector<16x96xf32>
    %38 = vector.shape_cast %37 : vector<16x96xf32> to vector<2x8x96xf32>
    %c0_19 = arith.constant 0 : index
    %c0_20 = arith.constant 0 : index
    %c0_21 = arith.constant 0 : index
    %39 = vector.load %arg18[%c0_19, %c0_20, %c0_21] : memref<2x8x96xf32, #tpu.memory_space<vmem>>, vector<2x8x96xf32>
    tpu.vector_store %arg18[%c0_19, %c0_20, %c0_21], %38 {strides = array<i32>} : memref<2x8x96xf32, #tpu.memory_space<vmem>>, vector<2x8x96xf32>,
    %c0_22 = arith.constant 0 : index
    %c0_23 = arith.constant 0 : index
    %c0_24 = arith.constant 0 : index
    %40 = vector.load %arg18[%c0_22, %c0_23, %c0_24] : memref<2x8x96xf32, #tpu.memory_space<vmem>>, vector<2x8x8xf32>
    %c0_25 = arith.constant 0 : index
    %c0_26 = arith.constant 0 : index
    %c32 = arith.constant 32 : index
    %41 = vector.load %arg18[%c0_25, %c0_26, %c32] : memref<2x8x96xf32, #tpu.memory_space<vmem>>, vector<2x8x8xf32>
    %c0_27 = arith.constant 0 : index
    %c0_28 = arith.constant 0 : index
    %c64 = arith.constant 64 : index
    %42 = vector.load %arg18[%c0_27, %c0_28, %c64] : memref<2x8x96xf32, #tpu.memory_space<vmem>>, vector<2x8x8xf32>
    %43 = arith.truncf %40 : vector<2x8x8xf32> to vector<2x8x8xbf16>
    %44 = arith.truncf %41 : vector<2x8x8xf32> to vector<2x8x8xbf16>
    "tpu.trace_start"() <{level = 10 : i32, message = "bqd,bkd->bqk"}> : () -> ()
    %cst_29 = arith.constant dense<0.000000e+00> : vector<2x8x8xf32>
    %45 = tpu.matmul %43, %44, %cst_29 {dimension_numbers = #tpu.dot_dimension_numbers<[2], [2], [1], [1], [0, 0, 0, 1, 1, 1], [0], [0]>} : vector<2x8x8xbf16>, vector<2x8x8xbf16>, vector<2x8x8xf32> -> vector<2x8x8xf32>
    "tpu.trace_stop"() : () -> ()
    %cst_30 = arith.constant dense<0xFF800000> : vector<2x8xf32>
    %46 = vector.multi_reduction <maximumf>, %45, %cst_30 [2] : vector<2x8x8xf32> to vector<2x8xf32>
    %47 = vector.shape_cast %46 : vector<2x8xf32> to vector<2x8x1xf32>
    %48 = vector.broadcast %47 : vector<2x8x1xf32> to vector<2x8x8xf32>
    %49 = arith.subf %45, %48 : vector<2x8x8xf32>
    %50 = math.exp %49 : vector<2x8x8xf32>
    %cst_31 = arith.constant dense<0.000000e+00> : vector<2x8xf32>
    %51 = vector.multi_reduction <add>, %50, %cst_31 [2] : vector<2x8x8xf32> to vector<2x8xf32>
    %52 = vector.shape_cast %51 : vector<2x8xf32> to vector<2x8x1xf32>
    %53 = tpu.reciprocal %52 {approx = true} : vector<2x8x1xf32> -> vector<2x8x1xf32>
    %54 = vector.broadcast %53 : vector<2x8x1xf32> to vector<2x8x8xf32>
    %55 = arith.mulf %50, %54 : vector<2x8x8xf32>
    %56 = arith.truncf %55 : vector<2x8x8xf32> to vector<2x8x8xbf16>
    %57 = arith.truncf %42 : vector<2x8x8xf32> to vector<2x8x8xbf16>
    "tpu.trace_start"() <{level = 10 : i32, message = "bqk,bkd->bqd"}> : () -> ()
    %cst_32 = arith.constant dense<0.000000e+00> : vector<2x8x8xf32>
    %58 = tpu.matmul %56, %57, %cst_32 {dimension_numbers = #tpu.dot_dimension_numbers<[2], [1], [1], [2], [0, 0, 0, 1, 1, 2], [0], [0]>} : vector<2x8x8xbf16>, vector<2x8x8xbf16>, vector<2x8x8xf32> -> vector<2x8x8xf32>
    "tpu.trace_stop"() : () -> ()
    %c0_33 = arith.constant 0 : index
    %c0_34 = arith.constant 0 : index
    %c0_35 = arith.constant 0 : index
    %59 = vector.load %arg19[%c0_33, %c0_34, %c0_35] : memref<2x8x32xf32, #tpu.memory_space<vmem>>, vector<2x8x8xf32>
    tpu.vector_store %arg19[%c0_33, %c0_34, %c0_35], %58 {strides = array<i32>} : memref<2x8x32xf32, #tpu.memory_space<vmem>>, vector<2x8x8xf32>,
    %c0_36 = arith.constant 0 : index
    %c0_37 = arith.constant 0 : index
    %c8 = arith.constant 8 : index
    %60 = vector.load %arg18[%c0_36, %c0_37, %c8] : memref<2x8x96xf32, #tpu.memory_space<vmem>>, vector<2x8x8xf32>
    %c0_38 = arith.constant 0 : index
    %c0_39 = arith.constant 0 : index
    %c40 = arith.constant 40 : index
    %61 = vector.load %arg18[%c0_38, %c0_39, %c40] : memref<2x8x96xf32, #tpu.memory_space<vmem>>, vector<2x8x8xf32>
    %c0_40 = arith.constant 0 : index
    %c0_41 = arith.constant 0 : index
    %c72 = arith.constant 72 : index
    %62 = vector.load %arg18[%c0_40, %c0_41, %c72] : memref<2x8x96xf32, #tpu.memory_space<vmem>>, vector<2x8x8xf32>
    %63 = arith.truncf %60 : vector<2x8x8xf32> to vector<2x8x8xbf16>
    %64 = arith.truncf %61 : vector<2x8x8xf32> to vector<2x8x8xbf16>
    "tpu.trace_start"() <{level = 10 : i32, message = "bqd,bkd->bqk"}> : () -> ()
    %cst_42 = arith.constant dense<0.000000e+00> : vector<2x8x8xf32>
    %65 = tpu.matmul %63, %64, %cst_42 {dimension_numbers = #tpu.dot_dimension_numbers<[2], [2], [1], [1], [0, 0, 0, 1, 1, 1], [0], [0]>} : vector<2x8x8xbf16>, vector<2x8x8xbf16>, vector<2x8x8xf32> -> vector<2x8x8xf32>
    "tpu.trace_stop"() : () -> ()
    %cst_43 = arith.constant dense<0xFF800000> : vector<2x8xf32>
    %66 = vector.multi_reduction <maximumf>, %65, %cst_43 [2] : vector<2x8x8xf32> to vector<2x8xf32>
    %67 = vector.shape_cast %66 : vector<2x8xf32> to vector<2x8x1xf32>
    %68 = vector.broadcast %67 : vector<2x8x1xf32> to vector<2x8x8xf32>
    %69 = arith.subf %65, %68 : vector<2x8x8xf32>
    %70 = math.exp %69 : vector<2x8x8xf32>
    %cst_44 = arith.constant dense<0.000000e+00> : vector<2x8xf32>
    %71 = vector.multi_reduction <add>, %70, %cst_44 [2] : vector<2x8x8xf32> to vector<2x8xf32>
    %72 = vector.shape_cast %71 : vector<2x8xf32> to vector<2x8x1xf32>
    %73 = tpu.reciprocal %72 {approx = true} : vector<2x8x1xf32> -> vector<2x8x1xf32>
    %74 = vector.broadcast %73 : vector<2x8x1xf32> to vector<2x8x8xf32>
    %75 = arith.mulf %70, %74 : vector<2x8x8xf32>
    %76 = arith.truncf %75 : vector<2x8x8xf32> to vector<2x8x8xbf16>
    %77 = arith.truncf %62 : vector<2x8x8xf32> to vector<2x8x8xbf16>
    "tpu.trace_start"() <{level = 10 : i32, message = "bqk,bkd->bqd"}> : () -> ()
    %cst_45 = arith.constant dense<0.000000e+00> : vector<2x8x8xf32>
    %78 = tpu.matmul %76, %77, %cst_45 {dimension_numbers = #tpu.dot_dimension_numbers<[2], [1], [1], [2], [0, 0, 0, 1, 1, 2], [0], [0]>} : vector<2x8x8xbf16>, vector<2x8x8xbf16>, vector<2x8x8xf32> -> vector<2x8x8xf32>
    "tpu.trace_stop"() : () -> ()
    %c0_46 = arith.constant 0 : index
    %c0_47 = arith.constant 0 : index
    %c8_48 = arith.constant 8 : index
    %79 = vector.load %arg19[%c0_46, %c0_47, %c8_48] : memref<2x8x32xf32, #tpu.memory_space<vmem>>, vector<2x8x8xf32>
    tpu.vector_store %arg19[%c0_46, %c0_47, %c8_48], %78 {strides = array<i32>} : memref<2x8x32xf32, #tpu.memory_space<vmem>>, vector<2x8x8xf32>,
    %c0_49 = arith.constant 0 : index
    %c0_50 = arith.constant 0 : index
    %c16 = arith.constant 16 : index
    %80 = vector.load %arg18[%c0_49, %c0_50, %c16] : memref<2x8x96xf32, #tpu.memory_space<vmem>>, vector<2x8x8xf32>
    %c0_51 = arith.constant 0 : index
    %c0_52 = arith.constant 0 : index
    %c48 = arith.constant 48 : index
    %81 = vector.load %arg18[%c0_51, %c0_52, %c48] : memref<2x8x96xf32, #tpu.memory_space<vmem>>, vector<2x8x8xf32>
    %c0_53 = arith.constant 0 : index
    %c0_54 = arith.constant 0 : index
    %c80 = arith.constant 80 : index
    %82 = vector.load %arg18[%c0_53, %c0_54, %c80] : memref<2x8x96xf32, #tpu.memory_space<vmem>>, vector<2x8x8xf32>
    %83 = arith.truncf %80 : vector<2x8x8xf32> to vector<2x8x8xbf16>
    %84 = arith.truncf %81 : vector<2x8x8xf32> to vector<2x8x8xbf16>
    "tpu.trace_start"() <{level = 10 : i32, message = "bqd,bkd->bqk"}> : () -> ()
    %cst_55 = arith.constant dense<0.000000e+00> : vector<2x8x8xf32>
    %85 = tpu.matmul %83, %84, %cst_55 {dimension_numbers = #tpu.dot_dimension_numbers<[2], [2], [1], [1], [0, 0, 0, 1, 1, 1], [0], [0]>} : vector<2x8x8xbf16>, vector<2x8x8xbf16>, vector<2x8x8xf32> -> vector<2x8x8xf32>
    "tpu.trace_stop"() : () -> ()
    %cst_56 = arith.constant dense<0xFF800000> : vector<2x8xf32>
    %86 = vector.multi_reduction <maximumf>, %85, %cst_56 [2] : vector<2x8x8xf32> to vector<2x8xf32>
    %87 = vector.shape_cast %86 : vector<2x8xf32> to vector<2x8x1xf32>
    %88 = vector.broadcast %87 : vector<2x8x1xf32> to vector<2x8x8xf32>
    %89 = arith.subf %85, %88 : vector<2x8x8xf32>
    %90 = math.exp %89 : vector<2x8x8xf32>
    %cst_57 = arith.constant dense<0.000000e+00> : vector<2x8xf32>
    %91 = vector.multi_reduction <add>, %90, %cst_57 [2] : vector<2x8x8xf32> to vector<2x8xf32>
    %92 = vector.shape_cast %91 : vector<2x8xf32> to vector<2x8x1xf32>
    %93 = tpu.reciprocal %92 {approx = true} : vector<2x8x1xf32> -> vector<2x8x1xf32>
    %94 = vector.broadcast %93 : vector<2x8x1xf32> to vector<2x8x8xf32>
    %95 = arith.mulf %90, %94 : vector<2x8x8xf32>
    %96 = arith.truncf %95 : vector<2x8x8xf32> to vector<2x8x8xbf16>
    %97 = arith.truncf %82 : vector<2x8x8xf32> to vector<2x8x8xbf16>
    "tpu.trace_start"() <{level = 10 : i32, message = "bqk,bkd->bqd"}> : () -> ()
    %cst_58 = arith.constant dense<0.000000e+00> : vector<2x8x8xf32>
    %98 = tpu.matmul %96, %97, %cst_58 {dimension_numbers = #tpu.dot_dimension_numbers<[2], [1], [1], [2], [0, 0, 0, 1, 1, 2], [0], [0]>} : vector<2x8x8xbf16>, vector<2x8x8xbf16>, vector<2x8x8xf32> -> vector<2x8x8xf32>
    "tpu.trace_stop"() : () -> ()
    %c0_59 = arith.constant 0 : index
    %c0_60 = arith.constant 0 : index
    %c16_61 = arith.constant 16 : index
    %99 = vector.load %arg19[%c0_59, %c0_60, %c16_61] : memref<2x8x32xf32, #tpu.memory_space<vmem>>, vector<2x8x8xf32>
    tpu.vector_store %arg19[%c0_59, %c0_60, %c16_61], %98 {strides = array<i32>} : memref<2x8x32xf32, #tpu.memory_space<vmem>>, vector<2x8x8xf32>,
    %c0_62 = arith.constant 0 : index
    %c0_63 = arith.constant 0 : index
    %c24 = arith.constant 24 : index
    %100 = vector.load %arg18[%c0_62, %c0_63, %c24] : memref<2x8x96xf32, #tpu.memory_space<vmem>>, vector<2x8x8xf32>
    %c0_64 = arith.constant 0 : index
    %c0_65 = arith.constant 0 : index
    %c56 = arith.constant 56 : index
    %101 = vector.load %arg18[%c0_64, %c0_65, %c56] : memref<2x8x96xf32, #tpu.memory_space<vmem>>, vector<2x8x8xf32>
    %c0_66 = arith.constant 0 : index
    %c0_67 = arith.constant 0 : index
    %c88 = arith.constant 88 : index
    %102 = vector.load %arg18[%c0_66, %c0_67, %c88] : memref<2x8x96xf32, #tpu.memory_space<vmem>>, vector<2x8x8xf32>
    %103 = arith.truncf %100 : vector<2x8x8xf32> to vector<2x8x8xbf16>
    %104 = arith.truncf %101 : vector<2x8x8xf32> to vector<2x8x8xbf16>
    "tpu.trace_start"() <{level = 10 : i32, message = "bqd,bkd->bqk"}> : () -> ()
    %cst_68 = arith.constant dense<0.000000e+00> : vector<2x8x8xf32>
    %105 = tpu.matmul %103, %104, %cst_68 {dimension_numbers = #tpu.dot_dimension_numbers<[2], [2], [1], [1], [0, 0, 0, 1, 1, 1], [0], [0]>} : vector<2x8x8xbf16>, vector<2x8x8xbf16>, vector<2x8x8xf32> -> vector<2x8x8xf32>
    "tpu.trace_stop"() : () -> ()
    %cst_69 = arith.constant dense<0xFF800000> : vector<2x8xf32>
    %106 = vector.multi_reduction <maximumf>, %105, %cst_69 [2] : vector<2x8x8xf32> to vector<2x8xf32>
    %107 = vector.shape_cast %106 : vector<2x8xf32> to vector<2x8x1xf32>
    %108 = vector.broadcast %107 : vector<2x8x1xf32> to vector<2x8x8xf32>
    %109 = arith.subf %105, %108 : vector<2x8x8xf32>
    %110 = math.exp %109 : vector<2x8x8xf32>
    %cst_70 = arith.constant dense<0.000000e+00> : vector<2x8xf32>
    %111 = vector.multi_reduction <add>, %110, %cst_70 [2] : vector<2x8x8xf32> to vector<2x8xf32>
    %112 = vector.shape_cast %111 : vector<2x8xf32> to vector<2x8x1xf32>
    %113 = tpu.reciprocal %112 {approx = true} : vector<2x8x1xf32> -> vector<2x8x1xf32>
    %114 = vector.broadcast %113 : vector<2x8x1xf32> to vector<2x8x8xf32>
    %115 = arith.mulf %110, %114 : vector<2x8x8xf32>
    %116 = arith.truncf %115 : vector<2x8x8xf32> to vector<2x8x8xbf16>
    %117 = arith.truncf %102 : vector<2x8x8xf32> to vector<2x8x8xbf16>
    "tpu.trace_start"() <{level = 10 : i32, message = "bqk,bkd->bqd"}> : () -> ()
    %cst_71 = arith.constant dense<0.000000e+00> : vector<2x8x8xf32>
    %118 = tpu.matmul %116, %117, %cst_71 {dimension_numbers = #tpu.dot_dimension_numbers<[2], [1], [1], [2], [0, 0, 0, 1, 1, 2], [0], [0]>} : vector<2x8x8xbf16>, vector<2x8x8xbf16>, vector<2x8x8xf32> -> vector<2x8x8xf32>
    "tpu.trace_stop"() : () -> ()
    %c0_72 = arith.constant 0 : index
    %c0_73 = arith.constant 0 : index
    %c24_74 = arith.constant 24 : index
    %119 = vector.load %arg19[%c0_72, %c0_73, %c24_74] : memref<2x8x32xf32, #tpu.memory_space<vmem>>, vector<2x8x8xf32>
    tpu.vector_store %arg19[%c0_72, %c0_73, %c24_74], %118 {strides = array<i32>} : memref<2x8x32xf32, #tpu.memory_space<vmem>>, vector<2x8x8xf32>,
    %c0_75 = arith.constant 0 : index
    %c0_76 = arith.constant 0 : index
    %c0_77 = arith.constant 0 : index
    %120 = vector.load %arg19[%c0_75, %c0_76, %c0_77] : memref<2x8x32xf32, #tpu.memory_space<vmem>>, vector<2x8x32xf32>
    %121 = vector.shape_cast %120 : vector<2x8x32xf32> to vector<16x32xf32>
    %122 = arith.truncf %121 : vector<16x32xf32> to vector<16x32xbf16>
    %c0_78 = arith.constant 0 : index
    %c0_79 = arith.constant 0 : index
    %c0_80 = arith.constant 0 : index
    %123 = vector.load %arg8[%c0_78, %c0_79, %c0_80] : memref<1x32x32xbf16, #tpu.memory_space<vmem>>, vector<1x32x32xbf16>
    %124 = vector.shape_cast %123 : vector<1x32x32xbf16> to vector<32x32xbf16>
    %cst_81 = arith.constant dense<0.000000e+00> : vector<16x32xf32>
    %125 = tpu.matmul %122, %124, %cst_81 {dimension_numbers = #tpu.dot_dimension_numbers<[1], [0], [0], [1], [0, 0, 1, 1], [], []>} : vector<16x32xbf16>, vector<32x32xbf16>, vector<16x32xf32> -> vector<16x32xf32>
    %c0_82 = arith.constant 0 : index
    %c0_83 = arith.constant 0 : index
    %c0_84 = arith.constant 0 : index
    %126 = vector.load %arg9[%c0_82, %c0_83, %c0_84] : memref<1x1x32xf32, #tpu.memory_space<vmem>>, vector<1x1x32xf32>
    %127 = vector.shape_cast %126 : vector<1x1x32xf32> to vector<1x32xf32>
    %128 = vector.broadcast %127 : vector<1x32xf32> to vector<16x32xf32>
    %129 = arith.addf %125, %128 : vector<16x32xf32>
    %130 = arith.addf %3, %129 : vector<16x32xf32>
    %c0_85 = arith.constant 0 : index
    %c0_86 = arith.constant 0 : index
    %c0_87 = arith.constant 0 : index
    %131 = vector.load %arg10[%c0_85, %c0_86, %c0_87] : memref<1x1x32xf32, #tpu.memory_space<vmem>>, vector<1x1x32xf32>
    %132 = vector.shape_cast %131 : vector<1x1x32xf32> to vector<1x32xf32>
    %c0_88 = arith.constant 0 : index
    %c0_89 = arith.constant 0 : index
    %c0_90 = arith.constant 0 : index
    %133 = vector.load %arg11[%c0_88, %c0_89, %c0_90] : memref<1x1x32xf32, #tpu.memory_space<vmem>>, vector<1x1x32xf32>
    %134 = vector.shape_cast %133 : vector<1x1x32xf32> to vector<1x32xf32>
    %cst_91 = arith.constant dense<0.000000e+00> : vector<16xf32>
    %135 = vector.multi_reduction <add>, %130, %cst_91 [1] : vector<16x32xf32> to vector<16xf32>
    %136 = vector.shape_cast %135 : vector<16xf32> to vector<16x1xf32>
    %cst_92 = arith.constant 3.200000e+01 : f32
    %137 = vector.broadcast %cst_92 : f32 to vector<16x1xf32>
    %138 = arith.divf %136, %137 : vector<16x1xf32>
    %139 = vector.broadcast %138 : vector<16x1xf32> to vector<16x32xf32>
    %140 = arith.subf %130, %139 : vector<16x32xf32>
    %141 = arith.mulf %140, %140 : vector<16x32xf32>
    %cst_93 = arith.constant dense<0.000000e+00> : vector<16xf32>
    %142 = vector.multi_reduction <add>, %141, %cst_93 [1] : vector<16x32xf32> to vector<16xf32>
    %143 = vector.shape_cast %142 : vector<16xf32> to vector<16x1xf32>
    %cst_94 = arith.constant 3.200000e+01 : f32
    %144 = vector.broadcast %cst_94 : f32 to vector<16x1xf32>
    %145 = arith.divf %143, %144 : vector<16x1xf32>
    %146 = vector.broadcast %138 : vector<16x1xf32> to vector<16x32xf32>
    %147 = arith.subf %130, %146 : vector<16x32xf32>
    %cst_95 = arith.constant 9.99999974E-6 : f32
    %148 = vector.broadcast %cst_95 : f32 to vector<16x1xf32>
    %149 = arith.addf %145, %148 : vector<16x1xf32>
    %150 = math.rsqrt %149 : vector<16x1xf32>
    %151 = vector.broadcast %150 : vector<16x1xf32> to vector<16x32xf32>
    %152 = arith.mulf %147, %151 : vector<16x32xf32>
    %153 = vector.broadcast %132 : vector<1x32xf32> to vector<16x32xf32>
    %154 = arith.mulf %152, %153 : vector<16x32xf32>
    %155 = vector.broadcast %134 : vector<1x32xf32> to vector<16x32xf32>
    %156 = arith.addf %154, %155 : vector<16x32xf32>
    %157 = arith.truncf %156 : vector<16x32xf32> to vector<16x32xbf16>
    %c0_96 = arith.constant 0 : index
    %c0_97 = arith.constant 0 : index
    %c0_98 = arith.constant 0 : index
    %158 = vector.load %arg12[%c0_96, %c0_97, %c0_98] : memref<1x32x128xbf16, #tpu.memory_space<vmem>>, vector<1x32x128xbf16>
    %159 = vector.shape_cast %158 : vector<1x32x128xbf16> to vector<32x128xbf16>
    %cst_99 = arith.constant dense<0.000000e+00> : vector<16x128xf32>
    %160 = tpu.matmul %157, %159, %cst_99 {dimension_numbers = #tpu.dot_dimension_numbers<[1], [0], [0], [1], [0, 0, 1, 1], [], []>} : vector<16x32xbf16>, vector<32x128xbf16>, vector<16x128xf32> -> vector<16x128xf32>
    %c0_100 = arith.constant 0 : index
    %c0_101 = arith.constant 0 : index
    %c0_102 = arith.constant 0 : index
    %161 = vector.load %arg13[%c0_100, %c0_101, %c0_102] : memref<1x1x128xf32, #tpu.memory_space<vmem>>, vector<1x1x128xf32>
    %162 = vector.shape_cast %161 : vector<1x1x128xf32> to vector<1x128xf32>
    %163 = vector.broadcast %162 : vector<1x128xf32> to vector<16x128xf32>
    %164 = arith.addf %160, %163 : vector<16x128xf32>
    %cst_103 = arith.constant 1.702000e+00 : f32
    %165 = vector.broadcast %cst_103 : f32 to vector<16x128xf32>
    %166 = arith.mulf %165, %164 : vector<16x128xf32>
    %167 = arith.negf %166 : vector<16x128xf32>
    %168 = math.exp %167 : vector<16x128xf32>
    %cst_104 = arith.constant 1.000000e+00 : f32
    %169 = vector.broadcast %cst_104 : f32 to vector<16x128xf32>
    %170 = arith.addf %169, %168 : vector<16x128xf32>
    %171 = arith.divf %169, %170 : vector<16x128xf32>
    %172 = arith.mulf %164, %171 : vector<16x128xf32>
    %173 = arith.truncf %172 : vector<16x128xf32> to vector<16x128xbf16>
    %c0_105 = arith.constant 0 : index
    %c0_106 = arith.constant 0 : index
    %c0_107 = arith.constant 0 : index
    %174 = vector.load %arg14[%c0_105, %c0_106, %c0_107] : memref<1x128x32xbf16, #tpu.memory_space<vmem>>, vector<1x128x32xbf16>
    %175 = vector.shape_cast %174 : vector<1x128x32xbf16> to vector<128x32xbf16>
    %cst_108 = arith.constant dense<0.000000e+00> : vector<16x32xf32>
    %176 = tpu.matmul %173, %175, %cst_108 {dimension_numbers = #tpu.dot_dimension_numbers<[1], [0], [0], [1], [0, 0, 1, 1], [], []>} : vector<16x128xbf16>, vector<128x32xbf16>, vector<16x32xf32> -> vector<16x32xf32>
    %c0_109 = arith.constant 0 : index
    %c0_110 = arith.constant 0 : index
    %c0_111 = arith.constant 0 : index
    %177 = vector.load %arg15[%c0_109, %c0_110, %c0_111] : memref<1x1x32xf32, #tpu.memory_space<vmem>>, vector<1x1x32xf32>
    %178 = vector.shape_cast %177 : vector<1x1x32xf32> to vector<1x32xf32>
    %179 = vector.broadcast %178 : vector<1x32xf32> to vector<16x32xf32>
    %180 = arith.addf %176, %179 : vector<16x32xf32>
    %181 = arith.addf %130, %180 : vector<16x32xf32>
    %c0_112 = arith.constant 0 : index
    %c0_113 = arith.constant 0 : index
    %182 = vector.load %arg17[%c0_112, %c0_113] : memref<16x32xf32, #tpu.memory_space<vmem>>, vector<16x32xf32>
    tpu.vector_store %arg17[%c0_112, %c0_113], %181 {strides = array<i32>} : memref<16x32xf32, #tpu.memory_space<vmem>>, vector<16x32xf32>,
    %c1_i32 = arith.constant 1 : i32
    %183 = arith.cmpi eq, %arg1, %c1_i32 : i32
    %184 = arith.extui %183 : i1 to i32
    %c0_i32_114 = arith.constant 0 : i32
    %185 = arith.cmpi ne, %184, %c0_i32_114 : i32
    scf.if %185 {
      %186 = vector.shape_cast %181 : vector<16x32xf32> to vector<2x8x32xf32>
      %c0_115 = arith.constant 0 : index
      %c0_116 = arith.constant 0 : index
      %c0_117 = arith.constant 0 : index
      %187 = vector.load %arg16[%c0_115, %c0_116, %c0_117] : memref<2x8x32xf32, #tpu.memory_space<vmem>>, vector<2x8x32xf32>
      tpu.vector_store %arg16[%c0_115, %c0_116, %c0_117], %186 {strides = array<i32>} : memref<2x8x32xf32, #tpu.memory_space<vmem>>, vector<2x8x32xf32>,
    } else {
    }
    return
  }
  func.func @transform_0(%arg0: i32, %arg1: i32) -> (i32, i32, i32) {
    %c0_i32 = arith.constant 0 : i32
    %c0_i32_0 = arith.constant 0 : i32
    %c0_i32_1 = arith.constant 0 : i32
    return %arg0, %c0_i32, %c0_i32_0 : i32, i32, i32
  }
  func.func @transform_1(%arg0: i32, %arg1: i32) -> (i32, i32) {
    %c0_i32 = arith.constant 0 : i32
    %c0_i32_0 = arith.constant 0 : i32
    %c0_i32_1 = arith.constant 0 : i32
    return %c0_i32, %c0_i32_0 : i32, i32
  }
  func.func @transform_2(%arg0: i32, %arg1: i32) -> (i32, i32, i32) {
    %c0_i32 = arith.constant 0 : i32
    %c0_i32_0 = arith.constant 0 : i32
    %c0_i32_1 = arith.constant 0 : i32
    return %arg1, %c0_i32, %c0_i32_0 : i32, i32, i32
  }
  func.func @transform_3(%arg0: i32, %arg1: i32) -> (i32, i32, i32) {
    %c0_i32 = arith.constant 0 : i32
    %c0_i32_0 = arith.constant 0 : i32
    %c0_i32_1 = arith.constant 0 : i32
    return %arg1, %c0_i32, %c0_i32_0 : i32, i32, i32
  }
  func.func @transform_4(%arg0: i32, %arg1: i32) -> (i32, i32, i32) {
    %c0_i32 = arith.constant 0 : i32
    %c0_i32_0 = arith.constant 0 : i32
    %c0_i32_1 = arith.constant 0 : i32
    return %arg1, %c0_i32, %c0_i32_0 : i32, i32, i32
  }
  func.func @transform_5(%arg0: i32, %arg1: i32) -> (i32, i32, i32) {
    %c0_i32 = arith.constant 0 : i32
    %c0_i32_0 = arith.constant 0 : i32
    %c0_i32_1 = arith.constant 0 : i32
    return %arg1, %c0_i32, %c0_i32_0 : i32, i32, i32
  }
  func.func @transform_6(%arg0: i32, %arg1: i32) -> (i32, i32, i32) {
    %c0_i32 = arith.constant 0 : i32
    %c0_i32_0 = arith.constant 0 : i32
    %c0_i32_1 = arith.constant 0 : i32
    return %arg1, %c0_i32, %c0_i32_0 : i32, i32, i32
  }
  func.func @transform_7(%arg0: i32, %arg1: i32) -> (i32, i32, i32) {
    %c0_i32 = arith.constant 0 : i32
    %c0_i32_0 = arith.constant 0 : i32
    %c0_i32_1 = arith.constant 0 : i32
    return %arg1, %c0_i32, %c0_i32_0 : i32, i32, i32
  }
  func.func @transform_8(%arg0: i32, %arg1: i32) -> (i32, i32, i32) {
    %c0_i32 = arith.constant 0 : i32
    %c0_i32_0 = arith.constant 0 : i32
    %c0_i32_1 = arith.constant 0 : i32
    return %arg1, %c0_i32, %c0_i32_0 : i32, i32, i32
  }
  func.func @transform_9(%arg0: i32, %arg1: i32) -> (i32, i32, i32) {
    %c0_i32 = arith.constant 0 : i32
    %c0_i32_0 = arith.constant 0 : i32
    %c0_i32_1 = arith.constant 0 : i32
    return %arg1, %c0_i32, %c0_i32_0 : i32, i32, i32
  }
  func.func @transform_10(%arg0: i32, %arg1: i32) -> (i32, i32, i32) {
    %c0_i32 = arith.constant 0 : i32
    %c0_i32_0 = arith.constant 0 : i32
    %c0_i32_1 = arith.constant 0 : i32
    return %arg1, %c0_i32, %c0_i32_0 : i32, i32, i32
  }
  func.func @transform_11(%arg0: i32, %arg1: i32) -> (i32, i32, i32) {
    %c0_i32 = arith.constant 0 : i32
    %c0_i32_0 = arith.constant 0 : i32
    %c0_i32_1 = arith.constant 0 : i32
    return %arg1, %c0_i32, %c0_i32_0 : i32, i32, i32
  }
  func.func @transform_12(%arg0: i32, %arg1: i32) -> (i32, i32, i32) {
    %c0_i32 = arith.constant 0 : i32
    %c0_i32_0 = arith.constant 0 : i32
    %c0_i32_1 = arith.constant 0 : i32
    return %arg1, %c0_i32, %c0_i32_0 : i32, i32, i32
  }
  func.func @transform_13(%arg0: i32, %arg1: i32) -> (i32, i32, i32) {
    %c0_i32 = arith.constant 0 : i32
    %c0_i32_0 = arith.constant 0 : i32
    %c0_i32_1 = arith.constant 0 : i32
    return %arg1, %c0_i32, %c0_i32_0 : i32, i32, i32
  }
  func.func @transform_14(%arg0: i32, %arg1: i32) -> (i32, i32, i32) {
    %c0_i32 = arith.constant 0 : i32
    %c0_i32_0 = arith.constant 0 : i32
    %c0_i32_1 = arith.constant 0 : i32
    return %arg0, %c0_i32, %c0_i32_0 : i32, i32, i32
  }
}

</mosaic_0001>

<bundles_post_ra>
// kernel: tpu_custom_call.1
= control target key start
LH: loop header
LB: loop body
LE: loop exit
PB: predicated region body
PF: predicated region fallthrough
CT: control target
= control target key end

     0   :  { %s2639_s0 = inlined_call_operand.vmem [shape: f32[4,8,32], index: 0, kind: input, shape index: {}]   ;;  %s2640_s1 = inlined_call_operand.vmem [shape: f32[8,8], index: 1, kind: input, shape index: {}]   ;;  %s2641_s2 = inlined_call_operand.vmem [shape: f32[2,1,32], index: 2, kind: input, shape index: {}]   ;;  %s2642_s3 = inlined_call_operand.vmem [shape: f32[2,1,32], index: 3, kind: input, shape index: {}]   ;;  %s2643_s4 = inlined_call_operand.vmem [shape: bf16[2,32,96], index: 4, kind: input, shape index: {}]   ;;  %s2644_s5 = inlined_call_operand.vmem [shape: f32[2,1,96], index: 5, kind: input, shape index: {}]   ;;  %s2645_s6 = inlined_call_operand.vmem [shape: bf16[2,32,32], index: 6, kind: input, shape index: {}]   ;;  %s2646_s7 = inlined_call_operand.vmem [shape: f32[2,1,32], index: 7, kind: input, shape index: {}]   ;;  %s2647_s8 = inlined_call_operand.vmem [shape: f32[2,1,32], index: 8, kind: input, shape index: {}]   ;;  %s2648_s9 = inlined_call_operand.vmem [shape: f32[2,1,32], index: 9, kind: input, shape index: {}]   ;;  %s2649_s10 = inlined_call_operand.vmem [shape: bf16[2,32,128], index: 10, kind: input, shape index: {}]   ;;  %s2650_s11 = inlined_call_operand.vmem [shape: f32[2,1,128], index: 11, kind: input, shape index: {}]   ;;  %s2651_s12 = inlined_call_operand.vmem [shape: bf16[2,128,32], index: 12, kind: input, shape index: {}]   ;;  %s2652_s13 = inlined_call_operand.vmem [shape: f32[2,1,32], index: 13, kind: input, shape index: {}]   ;;  %s2653_s14 = inlined_call_operand.hbm [shape: f32[4,8,32], index: 14, kind: output, shape index: {}]  }
   0x1   :  { %2669 = sst [smem:[#allocation21_spill]] %s2639_s0 }
   0x2   :  { %2670 = sst [smem:[#allocation22_spill]] %s2643_s4 }
   0x3   :  { %2671 = sst [smem:[#allocation23_spill]] %s2645_s6 }
   0x4   :  { %2672 = sst [smem:[#allocation24_spill]] %s2647_s8 }
   0x5   :  { %2673 = sst [smem:[#allocation25_spill]] %s2651_s12 }
   0x6   :  { %2674 = sst [smem:[#allocation26_spill]] %s2653_s14 }
   0x7   :  { %19 = vsyncpa [#allocation6], 0 }
   0x8   :  { %21 = vsyncpa [#allocation6 + $0x1], 0  ;;  %s2242_s28 = smov 0   ;;  %s2244_s29 = smov 0  }
   0x9   :  { %s2246_s30 = smov 0   ;;  %s2248_s15 = smov 0  }
   0xa   :  { %s2250_s1 = smov 0   ;;  %s2252_s16 = smov 0  }
   0xb   :  { %s2254_s17 = smov 0   ;;  %s2256_s18 = smov 0  }
   0xc LB: > { %2675 = sst [smem:[#allocation8_spill]] %s2121_s28  ;;  %s1791_s19 = sadd.s32 4294967295, %s2149_s18   ;;  %s2149_s18 = sphi %s2256_s18, %s27_s18   ;;  %s2145_s17 = sphi %s2254_s17, %s2718_s17   ;;  %s2141_s16 = sphi %s2252_s16, %s2717_s16   ;;  %s2137_s1 = sphi %s2250_s1, %s2716_s1   ;;  %s2133_s15 = sphi %s2248_s15, %s2715_s15   ;;  %s2129_s30 = sphi %s2246_s30, %s2714_s30   ;;  %s2125_s29 = sphi %s2244_s29, %s2713_s29   ;;  %s2121_s28 = sphi %s2242_s28, %s2712_s28  }
   0xd   : > { %2676 = sst [smem:[#allocation9_spill]] %s2125_s29  ;;  %s1792_s20 = sadd.s32 4294967294, %s2149_s18  }
   0xe   : > { %2677 = sst [smem:[#allocation10_spill]] %s2129_s30  ;;  %s36_s21 = sadd.s32 1, %s2141_s16 }
   0xf   : > { %2678 = sst [smem:[#allocation11_spill]] %s2133_s15  ;;  %p37_p0 = scmp.ge.s32.totalorder %s36_s21, 2 }
  0x10   : > { %2679 = sst [smem:[#allocation12_spill]] %s2137_s1  ;;  %s39_s22 = sadd.s32 1, %s2145_s17 }
  0x11   : > { %2680 = sst [smem:[#allocation13_spill]] %s2141_s16  ;;  %p415_p1 = scmp.ne.s32.totalorder %s2129_s30, %s2125_s29 }
  0x12   : > { %2681 = sst [smem:[#allocation14_spill]] %s2145_s17  ;;  %p416_p2 = scmp.eq.s32.totalorder %s1791_s19, 3 }
  0x13   : > { %2682 = sst [smem:[#allocation15_spill]] %s2149_s18  ;;  %s2720_s21 = smov (%p37_p0, %s36_s21), 0 }
  0x14   : > { %2683 = sst [smem:[#allocation16_spill]] %s2720_s21  ;;  %s2722_s22 = smov (!%p37_p0, %s39_s22), %s2145_s17 }
  0x15   : > { %p2291_p3 = por %p416_p2, %p415_p1  ;;  %p421_p4 = scmp.ne.s32.totalorder %s2125_s29, %s2121_s28 }
  0x16   : > { %p41_p5 = scmp.ge.s32.totalorder %s2722_s22, 2  ;;  %p422_p6 = scmp.eq.s32.totalorder %s1792_s20, 3 }
  0x17   : > { %s2684_s23 = scalar_select %p2291_p3, 1, 0 }
  0x18   : > { %p1795_p7 = scmp.ge.s32.totalorder %s2149_s18, 1  ;;  %p532_p8 = scmp.lt.s32.totalorder %s2149_s18, 5 }
  0x19   : > { %2685 = sst [smem:[#allocation17_spill]] %s2684_s23  ;;  %s2724_s22 = smov (%p41_p5, %s2722_s22), 0 }
  0x1a   : > { %2686 = sst [smem:[#allocation18_spill]] %s2724_s22  ;;  %p2301_p9 = por %p422_p6, %p421_p4 }
  0x1b   : > { %p533_p10 = pnand %p1795_p7, %p532_p8  ;;  %s402_s25 = ssub.s32 %s2145_s17, %s2724_s22 }
  0x1c   : > { %s2687_s24 = scalar_select %p2301_p9, 1, 0 }
  0x1d   : > { %s405_s26 = sadd.s32 1, %s2129_s30  ;;  %p403_p11 = scmp.eq.s32.totalorder %s402_s25, 0 }
  0x1e   : > { %2688 = sst [smem:[#allocation19_spill]] %s2687_s24  ;;  %536 = sbr.rel (%p533_p10) target bundleno = 2082 (0x822), region = 76 }
  0x1f   : > { %s2309_s27 = scalar_select %p403_p11, %s2129_s30, %s405_s26  }
  0x20   : > { %s2656_s19 = sand.u32 (!%p533_p10), 1, %s2125_s29   ;;  %s1797_s20 = sshll.u32 (!%p533_p10), %s2137_s1, 1 }
  0x21   : > { %2689 = sst [smem:[#allocation20_spill]] %s2309_s27  ;;  %s1796_s21 = sshll.u32 (!%p533_p10), %s2656_s19, 4 }
  0x22   : > { %p623_p12 = scmp.lt.s32.totalorder (!%p533_p10), %s1797_s20, 3  ;;  %p628_p13 = scmp.lt.s32.totalorder (!%p533_p10), %s2133_s15, 1 }
  0x23   : > { %s2690_s0 = sld [smem:[#allocation21_spill]]  ;;  %s2376_s29 = scalar_lea.vmem [#allocation5], %s1796_s21 }
  0x24   : > { %s2726_s20 = smov (!%p623_p12, %s1797_s20), 3  ;;  %s2691_s4 = sld [smem:[#allocation22_spill]] }
  0x25   : > { %s2317_s16 = scalar_select %p628_p13, %s2133_s15, 1 }
  0x26   : > { %s1798_s25 = sshll.u32 %s2726_s20, 3  ;;  %s2692_s6 = sld [smem:[#allocation23_spill]] }
  0x27   : > { %s1891_s14 = sshll.u32 %s2317_s16, 4  ;;  %s663_s12 = scalar_lea.vmem %s2650_s11, %s2317_s16 }
  0x28   : > { %s2360_s20 = scalar_lea.vmem %s2649_s10, %s1891_s14  ;;  %s671_s28 = scalar_lea.vmem %s2652_s13, %s2317_s16 }
  0x29   : > { %s626_s19 = scalar_lea.vmem %s2690_s0, %s1798_s25  ;;  %s655_s0 = scalar_lea.vmem %s2648_s9, %s2317_s16 }
  0x2a   : > { %s2334_s1 = scalar_lea.vmem %s2691_s4, %s1891_s14  ;;  %s2694_s30 = sld [smem:[#allocation25_spill]] }
  0x2b   : > { %s2695_s23 = sld [smem:[#allocation11_spill]] }
  0x2c   : > { %s2343_s26 = scalar_lea.vmem %s2692_s6, %s1891_s14  ;;  %s1894_s6 = sshll.u32 %s2317_s16, 6 }
  0x30   : > { %s2374_s8 = scalar_lea.vmem %s2694_s30, %s1894_s6 }
  0x31   : > { %p1807_p0 = scmp.ne.s32.totalorder %s2695_s23, 0 }
  0x33   : > { %677 = sbr.rel (%p1807_p0) target bundleno = 59 (0x3b), region = 80 }
  0x38   : > { %v678_v0 = vld [vmem:[%s626_s19] sm:$0xff]  ;;  %vm680_vm0 = vcmask 261120   ;;  %v679_v1 = vld [vmem:[%s626_s19 + $0x8] sm:$0xff] }
  0x39   : > { %681 = vst.msk [vmem:[#allocation2] sm:$0xff] %vm680_vm0, %v678_v0 }
  0x3a   : > { %682 = vst.msk [vmem:[#allocation2 + $0x8] sm:$0xff] %vm680_vm0, %v679_v1 }
  0x3b PF: > { %vm687_vm1 = vcmask 261120   ;;  %v2151_v6 = vmov 32.0   ;;  %v1896_v23 = vld [vmem:[%s2334_s1 + $0x8] sm:$0xff]  ;;  %v1895_v25 = vld [vmem:[%s2334_s1] sm:$0xff]  ;;  %s2696_s14 = scalar_lea.vmem %s2641_s2, %s2317_s16  ;;  %s2697_s21 = scalar_lea.vmem %s2642_s3, %s2317_s16  ;;  %vm787_vm9 = vcmask 785408   ;;  %vm799_vm10 = vcmask 64512  }
  0x3c   : > { %2005 = vrcp.f32 %v2151_v6  ;;  %779 = vmatpush.bf16.msra.mxu0 %v1896_v23  ;;  %v1997_v44 = vld [vmem:[%s2696_s14] ss:$0 sm:$0xff]  ;;  %s2698_s22 = scalar_lea.vmem %s2644_s5, %s2317_s16  ;;  %s2152_s25 = smov 120   ;;  %vm872_vm11 = vcmask 1043456   ;;  %vm1042_vm12 = vcmask 130112   ;;  %vm1175_vm13 = vcmask 195712  }
  0x3d   : > { %v1998_v49 = vld [vmem:[%s2697_s21] ss:$0 sm:$0xff]  ;;  %s2153_s17 = smov 88   ;;  %s2154_s27 = smov 96   ;;  %vm1308_vm14 = vcmask 261312  }
  0x3e   : > { %v1999_v54 = vld [vmem:[%s2698_s22] ss:$0 sm:$0xff]  ;;  %s2155_s18 = smov 112   ;;  %s2156_s24 = smov 80  }
  0x3f   : > { %s2157_s23 = smov 104   ;;  %s2158_s4 = smov 72  }
  0x40   : > { %v2379_v2 = vld [vmem:[#allocation2] sm:$0xff]  ;;  %780 = vmatpush.bf16.msra.mxu0 %v1895_v25  ;;  %s2159_s6 = smov 64   ;;  %s2160_s14 = smov 48  }
  0x41   : > { %v688_v3 = vsel %vm687_vm1, %v2379_v2, 0.0  ;;  %v2383_v4 = vld [vmem:[#allocation2 + $0x8] sm:$0xff]  ;;  %s2161_s30 = smov 56   ;;  %s2162_s1 = smov 40  }
  0x42   : > { %689 = vadd.xlane.f32.xlu0 %v688_v3  ;;  %v691_v5 = vsel %vm687_vm1, %v2383_v4, 0.0  ;;  %v2006_v7 = vpop.eup %2005  ;;  %s2163_s21 = smov 16   ;;  %s2164_s19 = smov 8  }
  0x43   : > { %v695_v8 = vmul.f32 32.0, %v2006_v7  ;;  %vm699_vm2 = vweird.f32 %v2006_v7  ;;  %s2165_s15 = smov 24  }
  0x45   : > { %v696_v9 = vsub.f32 1.0, %v695_v8 }
  0x47   : > { %v697_v10 = vmul.f32 %v2006_v7, %v696_v9 }
  0x49   : > { %v698_v11 = vadd.f32 %v2006_v7, %v697_v10 }
  0x4a   : > { %692 = vadd.xlane.f32.xlu0 %v691_v5 }
  0x4b   : > { %v2387_v12 = vsel %vm699_vm2, %v2006_v7, %v698_v11 }
  0xb5   : > { %v690_v13 = vpop.xlane.xlu0 %689 }
  0xb6   : > { %v701_v14 = vmul.f32 %v2387_v12, %v690_v13 }
  0xb8   : > { %v703_v15 = vsub.f32 %v2379_v2, %v701_v14 }
  0xba   : > { %v705_v16 = vmul.f32 %v703_v15, %v703_v15 }
  0xbc   : > { %v707_v17 = vsel %vm687_vm1, %v705_v16, 0.0 }
  0xbd   : > { %708 = vadd.xlane.f32.xlu1 %v707_v17  ;;  %v693_v18 = vpop.xlane.xlu0 %692 }
  0xbe   : > { %v702_v19 = vmul.f32 %v2387_v12, %v693_v18 }
  0xc0   : > { %v704_v20 = vsub.f32 %v2383_v4, %v702_v19 }
  0xc2   : > { %v706_v21 = vmul.f32 %v704_v20, %v704_v20 }
  0xc4   : > { %v710_v22 = vsel %vm687_vm1, %v706_v21, 0.0 }
  0xc5   : > { %711 = vadd.xlane.f32.xlu1 %v710_v22 }
 0x130   : > { %v709_v24 = vpop.xlane.xlu1 %708 }
 0x131   : > { %v713_v26 = vmul.f32 %v709_v24, %v2387_v12 }
 0x133   : > { %v715_v27 = vadd.f32 1e-05, %v713_v26 }
 0x135   : > { %2007 = vrsqrt.f32 %v715_v27  ;;  %vm723_vm4 = vweird.f32 %v715_v27 }
 0x138   : > { %v712_v28 = vpop.xlane.xlu1 %711 }
 0x139   : > { %v714_v29 = vmul.f32 %v712_v28, %v2387_v12 }
 0x13b   : > { %v2008_v30 = vpop.eup %2007  ;;  %v716_v31 = vadd.f32 1e-05, %v714_v29 }
 0x13c   : > { %v718_v32 = vmul.f32 %v2008_v30, %v715_v27  ;;  %vm724_vm3 = vweird.f32 %v2008_v30 }
 0x13d   : > { %2009 = vrsqrt.f32 %v716_v31  ;;  %vm725_vm5 = vmor %vm723_vm4, %vm724_vm3  ;;  %vm733_vm7 = vweird.f32 %v716_v31 }
 0x13e   : > { %v719_v33 = vmul.f32 %v2008_v30, %v718_v32 }
 0x140   : > { %v720_v34 = vmul.f32 0.5, %v719_v33 }
 0x142   : > { %v721_v35 = vsub.f32 1.5, %v720_v34 }
 0x143   : > { %v2010_v36 = vpop.eup %2009 }
 0x144   : > { %v722_v37 = vmul.f32 %v2008_v30, %v721_v35  ;;  %v728_v38 = vmul.f32 %v2010_v36, %v716_v31  ;;  %vm734_vm6 = vweird.f32 %v2010_v36 }
 0x145   : > { %vm735_vm8 = vmor %vm733_vm7, %vm734_vm6 }
 0x146   : > { %v729_v39 = vmul.f32 %v2010_v36, %v728_v38  ;;  %v726_v40 = vsel %vm725_vm5, %v2008_v30, %v722_v37 }
 0x147   : > { %v737_v43 = vmul.f32 %v726_v40, %v703_v15 }
 0x148   : > { %v730_v41 = vmul.f32 0.5, %v729_v39 }
 0x149   : > { %v742_v48 = vmul.f32 %v1997_v44, %v737_v43 }
 0x14a   : > { %v731_v42 = vsub.f32 1.5, %v730_v41 }
 0x14b   : > { %v747_v51 = vadd.f32 %v1998_v49, %v742_v48 }
 0x14c   : > { %v732_v45 = vmul.f32 %v2010_v36, %v731_v42 }
 0x14e   : > { %v736_v46 = vsel %vm735_vm8, %v2010_v36, %v732_v45 }
 0x14f   : > { %v738_v47 = vmul.f32 %v736_v46, %v704_v20 }
 0x151   : > { %v743_v50 = vmul.f32 %v1997_v44, %v738_v47 }
 0x153   : > { %v748_v52 = vadd.f32 %v1998_v49, %v743_v50 }
 0x155   : > { %v749_v53 = vpack.c.bf16 %v748_v52, %v747_v51 }
 0x157   : > { %1816 = vmatmul.msk.bf16.vlgmr.msra.gmra.mxu0 %vm687_vm1, %v749_v53 }
 0x1d4   : > { %v782_v55 = vpop.f32.mrf.mxu0 }
 0x1d5   : > { %v783_v56 = vadd.f32 %v1999_v54, %v782_v55 }
 0x1d7   : > { %788 = vst.msk [vmem:[#allocation3] sm:$0xff] %vm787_vm9, %v783_v56 }
 0x1dc   : > { %v784_v57 = vpop.f32.mrf.mxu0 }
 0x1dd   : > { %v785_v58 = vadd.f32 %v1999_v54, %v784_v57 }
 0x1de   : > { %v912_v59 = vld [vmem:[#allocation3] sm:$0xff] }
 0x1df   : > { %789 = vst.msk [vmem:[#allocation3 + $0x8] sm:$0xff] %vm787_vm9, %v785_v58  ;;  %v914_v60 = vpack.c.bf16 %v912_v59, %v912_v59 }
 0x1e1   : > { %v917_v61 = vunpack.c.l.b16 %v914_v60 }
 0x1e3   : > { %v2415_v62 = vpack.c.b16 %v917_v61, %v917_v61 }
 0x1e5   : > { %919 = vrot.lane.b32.xlu1 %v2415_v62, %s2152_s25  ;;  %921 = vrot.lane.b32.xlu0 %v2415_v62, %s2153_s17 }
 0x1e6   : > { %797 = vrot.lane.b32.xlu2 %v2415_v62, %s2154_s27  ;;  %v1046_v63 = vld [vmem:[#allocation3 + $0x8] sm:$0xff] }
 0x1e7   : > { %v1048_v0 = vpack.c.bf16 %v1046_v63, %v1046_v63 }
 0x1e9   : > { %v1076_v1 = vunpack.c.l.b16 %v1048_v0 }
 0x1eb   : > { %v2420_v3 = vpack.c.b16 %v1076_v1, %v1076_v1 }
 0x1ed   : > { %1078 = vrot.lane.b32.xlu1 %v2420_v3, %s2155_s18  ;;  %1080 = vrot.lane.b32.xlu0 %v2420_v3, %s2156_s24 }
 0x1ee   : > { %822 = vrot.lane.b32.xlu2 %v2420_v3, %s2154_s27  ;;  %s2700_s27 = sld [smem:[#allocation24_spill]] }
 0x1f5   : > { %1185 = vrot.lane.b32.xlu1 %v2415_v62, %s2157_s23  ;;  %1187 = vrot.lane.b32.xlu0 %v2415_v62, %s2158_s4 }
 0x1f6   : > { %947 = vrot.lane.b32.xlu2 %v2420_v3, %s2153_s17  ;;  %s2699_s17 = scalar_lea.vmem %s2646_s7, %s2317_s16 }
 0x1fd   : > { %1211 = vrot.lane.b32.xlu0 %v2420_v3, %s2157_s23 }
 0x1fe   : > { %945 = vrot.lane.b32.xlu2 %v2420_v3, %s2152_s25 }
 0x205   : > { %867 = vrot.lane.b32.xlu0 %v2415_v62, %s2159_s6 }
 0x206   : > { %1054 = vrot.lane.b32.xlu2 %v2415_v62, %s2156_s24 }
 0x20e   : > { %1052 = vrot.lane.b32.xlu2 %v2415_v62, %s2155_s18  ;;  %s2701_s18 = scalar_lea.vmem %s2700_s27, %s2317_s16 }
 0x216   : > { %1213 = vrot.lane.b32.xlu2 %v2420_v3, %s2158_s4 }
 0x240   : > { %v798_v5 = vpop.permute.xlu2 %797 }
 0x241   : > { %v804_v6 = vsel %vm799_vm10, %v798_v5, 0 }
 0x242   : > { %813 = vmatpush.bf16.xpose.msra.mxu1 %v804_v6 }
 0x248   : > { %v823_v7 = vpop.permute.xlu2 %822 }
 0x249   : > { %1817 = vmatmul.msk.bf16.vlgmr.msra.gmra.mxu1 %vm799_vm10, %v914_v60  ;;  %v828_v8 = vsel %vm799_vm10, %v823_v7, 0 }
 0x24a   : > { %837 = vmatpush.bf16.xpose.msra.mxu2 %v828_v8 }
 0x250   : > { %v948_v9 = vpop.permute.xlu2 %947 }
 0x251   : > { %1818 = vmatmul.msk.bf16.vlgmr.msra.gmra.mxu2 %vm799_vm10, %v1048_v0  ;;  %v953_v10 = vsel %vm799_vm10, %v948_v9, 0 }
 0x252   : > { %962 = vmatpush.bf16.xpose.msrb.mxu1 %v953_v10 }
 0x257   : > { %v922_v11 = vpop.permute.xlu0 %921  ;;  %v920_v15 = vpop.permute.xlu1 %919 }
 0x258   : > { %v946_v13 = vpop.permute.xlu2 %945  ;;  %v927_v14 = vsel %vm799_vm10, %v922_v11, 0 }
 0x259   : > { %1822 = vmatmul.msk.bf16.vlgmr.msrb.gmra.mxu1 %vm799_vm10, %v946_v13  ;;  %936 = vmatpush.bf16.xpose.msrb.mxu0 %v927_v14 }
 0x25f   : > { %v1081_v16 = vpop.permute.xlu0 %1080  ;;  %v1079_v21 = vpop.permute.xlu1 %1078 }
 0x260   : > { %v1086_v17 = vsel %vm799_vm10, %v1081_v16, 0  ;;  %v1055_v18 = vpop.permute.xlu2 %1054  ;;  %1821 = vmatmul.msk.bf16.vlgmr.msrb.gmra.mxu0 %vm799_vm10, %v920_v15 }
 0x261   : > { %v1060_v19 = vsel %vm799_vm10, %v1055_v18, 0  ;;  %1095 = vmatpush.bf16.xpose.msra.mxu1 %v1086_v17 }
 0x262   : > { %1069 = vmatpush.bf16.xpose.msra.mxu0 %v1060_v19 }
 0x267   : > { %v1188_v20 = vpop.permute.xlu0 %1187  ;;  %v1186_v29 = vpop.permute.xlu1 %1185 }
 0x268   : > { %v1193_v22 = vsel %vm799_vm10, %v1188_v20, 0  ;;  %v1053_v23 = vpop.permute.xlu2 %1052 }
 0x269   : > { %1826 = vmatmul.msk.bf16.vlgmr.msra.gmra.mxu1 %vm799_vm10, %v1079_v21 }
 0x26a   : > { %1202 = vmatpush.bf16.xpose.msrb.mxu0 %v1193_v22 }
 0x26f   : > { %v1212_v24 = vpop.permute.xlu0 %1211 }
 0x270   : > { %v1214_v25 = vpop.permute.xlu2 %1213  ;;  %1825 = vmatmul.msk.bf16.vlgmr.msra.gmra.mxu0 %vm799_vm10, %v1053_v23 }
 0x271   : > { %v1219_v26 = vsel %vm799_vm10, %v1214_v25, 0 }
 0x272   : > { %1228 = vmatpush.bf16.xpose.msrb.mxu1 %v1219_v26 }
 0x277   : > { %v868_v27 = vpop.permute.xlu0 %867 }
 0x278   : > { %v874_v28 = vsel %vm872_vm11, %v868_v27, 0 }
 0x279   : > { %1830 = vmatmul.msk.bf16.vlgmr.msrb.gmra.mxu1 %vm799_vm10, %v1212_v24  ;;  %883 = vmatpush.bf16.msra.mxu3 %v874_v28 }
 0x280   : > { %1829 = vmatmul.msk.bf16.vlgmr.msrb.gmra.mxu0 %vm799_vm10, %v1186_v29 }
 0x2c6   : > { %v815_v30 = vpop.f32.mrf.mxu1 }
 0x2c7   : > { %v843_v31 = vsel %vm799_vm10, %v815_v30, -inf }
 0x2c8   : > { %844 = vmax.xlane.f32.xlu2 %v843_v31 }
 0x2ce   : > { %v817_v32 = vpop.f32.mrf.mxu1 }
 0x2d4   : > { %v839_v33 = vpop.f32.mrf.mxu2 }
 0x2d5   : > { %v846_v34 = vsel %vm799_vm10, %v839_v33, -inf }
 0x2d6   : > { %847 = vmax.xlane.f32.xlu1 %v846_v34  ;;  %v2454_v35 = vpop.f32.mrf.mxu1 }
 0x2d7   : > { %v971_v36 = vsel %vm799_vm10, %v2454_v35, -inf }
 0x2d8   : > { %972 = vmax.xlane.f32.xlu2 %v971_v36 }
 0x2dc   : > { %v841_v37 = vpop.f32.mrf.mxu2 }
 0x2dd   : > { %v938_v38 = vpop.f32.mrf.mxu0 }
 0x2de   : > { %v966_v39 = vpop.f32.mrf.mxu1  ;;  %v968_v40 = vsel %vm799_vm10, %v938_v38, -inf }
 0x2df   : > { %969 = vmax.xlane.f32.xlu0 %v968_v40 }
 0x2e5   : > { %v940_v41 = vpop.f32.mrf.mxu0 }
 0x2e6   : > { %v2459_v42 = vpop.f32.mrf.mxu1 }
 0x2e7   : > { %v1104_v43 = vsel %vm799_vm10, %v2459_v42, -inf }
 0x2e8   : > { %1105 = vmax.xlane.f32.xlu1 %v1104_v43 }
 0x2ed   : > { %v1071_v44 = vpop.f32.mrf.mxu0 }
 0x2ee   : > { %v1099_v45 = vpop.f32.mrf.mxu1  ;;  %v1101_v46 = vsel %vm799_vm10, %v1071_v44, -inf }
 0x2ef   : > { %1102 = vmax.xlane.f32.xlu2 %v1101_v46 }
 0x2f5   : > { %v1073_v47 = vpop.f32.mrf.mxu0 }
 0x2f6   : > { %v2464_v48 = vpop.f32.mrf.mxu1 }
 0x2f7   : > { %v1237_v49 = vsel %vm799_vm10, %v2464_v48, -inf }
 0x2f8   : > { %1238 = vmax.xlane.f32.xlu0 %v1237_v49 }
 0x2fd   : > { %v1204_v50 = vpop.f32.mrf.mxu0 }
 0x2fe   : > { %v1232_v51 = vpop.f32.mrf.mxu1  ;;  %v1234_v52 = vsel %vm799_vm10, %v1204_v50, -inf }
 0x2ff   : > { %1235 = vmax.xlane.f32.xlu2 %v1234_v52 }
 0x305   : > { %v1206_v53 = vpop.f32.mrf.mxu0 }
 0x30c   : > { %1125 = vrot.lane.b32.xlu0 %v2415_v62, %s2160_s14 }
 0x317   : > { %992 = vrot.lane.b32.xlu2 %v2415_v62, %s2161_s30 }
 0x33b   : > { %v845_v54 = vpop.xlane.xlu2 %844 }
 0x33c   : > { %v849_v55 = vsub.f32 %v815_v30, %v845_v54 }
 0x33e   : > { %v851_v56 = vmul.f32 1.442695, %v849_v55 }
 0x340   : > { %2011 = vpow2.f32 %v851_v56 }
 0x346   : > { %v2012_v57 = vpop.eup %2011 }
 0x347   : > { %v855_v58 = vsel %vm799_vm10, %v2012_v57, 0.0 }
 0x348   : > { %856 = vadd.xlane.f32.xlu1 %v855_v58 }
 0x349   : > { %v848_v59 = vpop.xlane.xlu1 %847 }
 0x34a   : > { %v850_v63 = vsub.f32 %v839_v33, %v848_v59 }
 0x34b   : > { %v973_v5 = vpop.xlane.xlu2 %972 }
 0x34c   : > { %v853_v1 = vmul.f32 1.442695, %v850_v63  ;;  %v975_v20 = vsub.f32 %v2454_v35, %v973_v5 }
 0x34e   : > { %v978_v22 = vmul.f32 1.442695, %v975_v20 }
 0x352   : > { %v970_v60 = vpop.xlane.xlu0 %969 }
 0x353   : > { %v974_v61 = vsub.f32 %v938_v38, %v970_v60 }
 0x355   : > { %v976_v0 = vmul.f32 1.442695, %v974_v61 }
 0x357   : > { %2013 = vpow2.f32 %v976_v0 }
 0x358   : > { %2015 = vpow2.f32 %v853_v1 }
 0x35b   : > { %v1106_v28 = vpop.xlane.xlu1 %1105 }
 0x35c   : > { %v1108_v29 = vsub.f32 %v2459_v42, %v1106_v28 }
 0x35d   : > { %v2474_v6 = vpop.eup %2013 }
 0x35e   : > { %v980_v7 = vsel %vm799_vm10, %v2474_v6, 0.0  ;;  %v2016_v9 = vpop.eup %2015  ;;  %v1111_v30 = vmul.f32 1.442695, %v1108_v29 }
 0x35f   : > { %981 = vadd.xlane.f32.xlu2 %v980_v7  ;;  %v858_v13 = vsel %vm799_vm10, %v2016_v9, 0.0 }
 0x361   : > { %889 = vrot.lane.b32.xlu1 %v2420_v3, %s2159_s6  ;;  %s2702_s6 = sld [smem:[#allocation11_spill]] }
 0x362   : > { %v1103_v8 = vpop.xlane.xlu2 %1102 }
 0x363   : > { %v1107_v10 = vsub.f32 %v1071_v44, %v1103_v8 }
 0x365   : > { %v1109_v11 = vmul.f32 1.442695, %v1107_v10 }
 0x367   : > { %2017 = vpow2.f32 %v1109_v11  ;;  %859 = vadd.xlane.f32.xlu2 %v858_v13  ;;  %p1885_p1 = scmp.ne.s32.totalorder %s2702_s6, 1 }
 0x36b   : > { %v1239_v19 = vpop.xlane.xlu0 %1238 }
 0x36c   : > { %v1241_v34 = vsub.f32 %v2464_v48, %v1239_v19 }
 0x36d   : > { %v2481_v14 = vpop.eup %2017 }
 0x36e   : > { %v1113_v15 = vsel %vm799_vm10, %v2481_v14, 0.0  ;;  %v1244_v35 = vmul.f32 1.442695, %v1241_v34 }
 0x36f   : > { %1114 = vadd.xlane.f32.xlu0 %v1113_v15 }
 0x372   : > { %v1236_v16 = vpop.xlane.xlu2 %1235 }
 0x373   : > { %v1240_v17 = vsub.f32 %v1204_v50, %v1236_v16 }
 0x375   : > { %v1242_v18 = vmul.f32 1.442695, %v1240_v17 }
 0x377   : > { %2019 = vpow2.f32 %v1242_v18 }
 0x378   : > { %2021 = vpow2.f32 %v978_v22 }
 0x379   : > { %2023 = vpow2.f32 %v1111_v30 }
 0x37a   : > { %v993_v40 = vpop.permute.xlu2 %992 }
 0x37b   : > { %v998_v44 = vsel %vm872_vm11, %v993_v40, 0 }
 0x37d   : > { %v2486_v21 = vpop.eup %2019 }
 0x37e   : > { %v1126_v23 = vpop.permute.xlu0 %1125  ;;  %v1246_v24 = vsel %vm799_vm10, %v2486_v21, 0.0  ;;  %v2022_v26 = vpop.eup %2021 }
 0x37f   : > { %1013 = vrot.lane.b32.xlu2 %v2420_v3, %s2161_s30  ;;  %v1131_v25 = vsel %vm872_vm11, %v1126_v23, 0  ;;  %1247 = vadd.xlane.f32.xlu0 %v1246_v24  ;;  %v983_v27 = vsel %vm799_vm10, %v2022_v26, 0.0  ;;  %v2496_v31 = vpop.eup %2023 }
 0x380   : > { %1140 = vmatpush.bf16.msrb.mxu2 %v1131_v25  ;;  %v1116_v32 = vsel %vm799_vm10, %v2496_v31, 0.0 }
 0x38b   : > { %984 = vadd.xlane.f32.xlu1 %v983_v27 }
 0x393   : > { %1279 = vrot.lane.b32.xlu0 %v2420_v3, %s2162_s1 }
 0x3a4   : > { %1146 = vrot.lane.b32.xlu1 %v2420_v3, %s2160_s14 }
 0x3a8   : > { %1117 = vadd.xlane.f32.xlu2 %v1116_v32 }
 0x3bb   : > { %v857_v33 = vpop.xlane.xlu1 %856 }
 0x3bc   : > { %2025 = vrcp.f32 %v857_v33 }
 0x3bd   : > { %2027 = vpow2.f32 %v1244_v35 }
 0x3c0   : > { %1258 = vrot.lane.b32.xlu2 %v2415_v62, %s2162_s1 }
 0x3c2   : > { %v2026_v36 = vpop.eup %2025 }
 0x3c3   : > { %v863_v37 = vmul.f32 %v2026_v36, %v2012_v57  ;;  %v2028_v39 = vpop.eup %2027 }
 0x3c4   : > { %v1249_v3 = vsel %vm799_vm10, %v2028_v39, 0.0 }
 0x3c5   : > { %v865_v38 = vpack.c.bf16 %v863_v37, %v863_v37 }
 0x3c7   : > { %1819 = vmatmul.msk.bf16.vlgmr.msra.gmra.mxu3 %vm799_vm10, %v865_v38 }
 0x3ce   : > { %1250 = vadd.xlane.f32.xlu1 %v1249_v3  ;;  %v1897_v3 = vld [vmem:[%s2343_s26] sm:$0xff] }
 0x3d2   : > { %v982_v41 = vpop.xlane.xlu2 %981 }
 0x3d3   : > { %v890_v42 = vpop.permute.xlu1 %889 }
 0x3d4   : > { %v895_v43 = vsel %vm872_vm11, %v890_v42, 0 }
 0x3d5   : > { %904 = vmatpush.bf16.msrb.mxu3 %v895_v43 }
 0x3d9   : > { %1007 = vmatpush.bf16.msra.mxu3 %v998_v44 }
 0x3da   : > { %v860_v62 = vpop.xlane.xlu2 %859 }
 0x3db   : > { %2029 = vrcp.f32 %v860_v62 }
 0x3e1   : > { %v2030_v45 = vpop.eup %2029 }
 0x3e2   : > { %v864_v46 = vmul.f32 %v2030_v45, %v2016_v9  ;;  %v1115_v47 = vpop.xlane.xlu0 %1114  ;;  %v1014_v48 = vpop.permute.xlu2 %1013  ;;  %v2000_v45 = vld [vmem:[%s2699_s17] ss:$0 sm:$0xff] }
 0x3e3   : > { %2031 = vrcp.f32 %v1115_v47  ;;  %v1019_v50 = vsel %vm872_vm11, %v1014_v48, 0 }
 0x3e4   : > { %v866_v49 = vpack.c.bf16 %v864_v46, %v864_v46  ;;  %2033 = vrcp.f32 %v982_v41 }
 0x3e6   : > { %1820 = vmatmul.msk.bf16.vlgmr.msrb.gmra.mxu3 %vm799_vm10, %v866_v49 }
 0x3e7   : > { %1028 = vmatpush.bf16.msrb.mxu3 %v1019_v50 }
 0x3e9   : > { %v2032_v51 = vpop.eup %2031 }
 0x3ea   : > { %v1121_v52 = vmul.f32 %v2032_v51, %v2481_v14  ;;  %v2034_v54 = vpop.eup %2033 }
 0x3eb   : > { %v988_v55 = vmul.f32 %v2034_v54, %v2474_v6 }
 0x3ec   : > { %v1123_v53 = vpack.c.bf16 %v1121_v52, %v1121_v52 }
 0x3ed   : > { %v990_v56 = vpack.c.bf16 %v988_v55, %v988_v55 }
 0x3ee   : > { %1827 = vmatmul.msk.bf16.vlgmr.msrb.gmra.mxu2 %vm799_vm10, %v1123_v53 }
 0x3f2   : > { %v1248_v61 = vpop.xlane.xlu0 %1247 }
 0x3f6   : > { %1823 = vmatmul.msk.bf16.vlgmr.msra.gmra.mxu3 %vm799_vm10, %v990_v56 }
 0x3fe   : > { %v985_v57 = vpop.xlane.xlu1 %984 }
 0x3ff   : > { %2035 = vrcp.f32 %v985_v57 }
 0x400   : > { %2037 = vrcp.f32 %v1248_v61 }
 0x405   : > { %v2036_v58 = vpop.eup %2035  ;;  %v1280_v63 = vpop.permute.xlu0 %1279 }
 0x406   : > { %v989_v59 = vmul.f32 %v2036_v58, %v2022_v26  ;;  %v1285_v5 = vsel %vm872_vm11, %v1280_v63, 0  ;;  %v2038_v7 = vpop.eup %2037  ;;  %v1900_v63 = vld [vmem:[%s2360_s20 + $0x8] sm:$0xff] }
 0x407   : > { %v1254_v9 = vmul.f32 %v2038_v7, %v2486_v21  ;;  %1439 = vmatpush.bf16.msra.mxu1 %v1900_v63 }
 0x408   : > { %v991_v60 = vpack.c.bf16 %v989_v59, %v989_v59 }
 0x409   : > { %v1256_v15 = vpack.c.bf16 %v1254_v9, %v1254_v9 }
 0x40a   : > { %1824 = vmatmul.msk.bf16.vlgmr.msrb.gmra.mxu3 %vm799_vm10, %v991_v60 }
 0x416   : > { %v1147_v0 = vpop.permute.xlu1 %1146 }
 0x417   : > { %v1152_v1 = vsel %vm872_vm11, %v1147_v0, 0 }
 0x418   : > { %1161 = vmatpush.bf16.msra.mxu3 %v1152_v1 }
 0x41b   : > { %v1118_v6 = vpop.xlane.xlu2 %1117 }
 0x41c   : > { %1294 = vmatpush.bf16.msrb.mxu3 %v1285_v5  ;;  %2039 = vrcp.f32 %v1118_v6  ;;  %v1899_v5 = vld [vmem:[%s2360_s20] sm:$0xff] }
 0x41d   : > { %1440 = vmatpush.bf16.msra.mxu1 %v1899_v5 }
 0x422   : > { %v2040_v8 = vpop.eup %2039 }
 0x423   : > { %v1122_v10 = vmul.f32 %v2040_v8, %v2496_v31  ;;  %v1259_v11 = vpop.permute.xlu2 %1258 }
 0x424   : > { %v1264_v13 = vsel %vm872_vm11, %v1259_v11, 0 }
 0x425   : > { %v1124_v14 = vpack.c.bf16 %v1122_v10, %v1122_v10  ;;  %1273 = vmatpush.bf16.msra.mxu2 %v1264_v13 }
 0x427   : > { %1828 = vmatmul.msk.bf16.vlgmr.msra.gmra.mxu3 %vm799_vm10, %v1124_v14 }
 0x428   : > { %1831 = vmatmul.msk.bf16.vlgmr.msra.gmra.mxu2 %vm799_vm10, %v1256_v15 }
 0x441   : > { %v1251_v16 = vpop.xlane.xlu1 %1250 }
 0x442   : > { %2041 = vrcp.f32 %v1251_v16 }
 0x448   : > { %v2042_v17 = vpop.eup %2041 }
 0x449   : > { %v1255_v18 = vmul.f32 %v2042_v17, %v2028_v39  ;;  %v1898_v39 = vld [vmem:[%s2343_s26 + $0x8] sm:$0xff] }
 0x44a   : > { %v885_v19 = vpop.f32.mrf.mxu3  ;;  %1343 = vmatpush.bf16.msra.mxu0 %v1898_v39 }
 0x44b   : > { %v1257_v20 = vpack.c.bf16 %v1255_v18, %v1255_v18  ;;  %910 = vst.msk [vmem:[#allocation4] sm:$0xff] %vm799_vm10, %v885_v19 }
 0x44d   : > { %1832 = vmatmul.msk.bf16.vlgmr.msrb.gmra.mxu3 %vm799_vm10, %v1257_v20 }
 0x44e   : > { %1344 = vmatpush.bf16.msra.mxu0 %v1897_v3 }
 0x452   : > { %v887_v21 = vpop.f32.mrf.mxu3 }
 0x469   : > { %v906_v22 = vpop.f32.mrf.mxu3 }
 0x46a   : > { %911 = vst.msk [vmem:[#allocation4 + $0x8] sm:$0xff] %vm799_vm10, %v906_v22 }
 0x471   : > { %v908_v23 = vpop.f32.mrf.mxu3  ;;  %v1142_v24 = vpop.f32.mrf.mxu2 }
 0x472   : > { %1169 = vrot.lane.b32.xlu1 %v1142_v24, %s2163_s21 }
 0x479   : > { %v1009_v25 = vpop.f32.mrf.mxu3  ;;  %v1144_v26 = vpop.f32.mrf.mxu2 }
 0x47a   : > { %1036 = vrot.lane.b32.xlu2 %v1009_v25, %s2164_s19  ;;  %v2002_v26 = vld [vmem:[%s655_s0] ss:$0 sm:$0xff] }
 0x481   : > { %v1011_v27 = vpop.f32.mrf.mxu3 }
 0x48d   : > { %v1030_v28 = vpop.f32.mrf.mxu3 }
 0x48e   : > { %1038 = vrot.lane.b32.xlu2 %v1030_v28, %s2164_s19 }
 0x495   : > { %v1032_v29 = vpop.f32.mrf.mxu3 }
 0x4aa   : > { %v1163_v30 = vpop.f32.mrf.mxu3 }
 0x4ab   : > { %1171 = vrot.lane.b32.xlu2 %v1163_v30, %s2163_s21  ;;  %v1275_v31 = vpop.f32.mrf.mxu2 }
 0x4ac   : > { %1302 = vrot.lane.b32.xlu0 %v1275_v31, %s2165_s15 }
 0x4b2   : > { %v1165_v32 = vpop.f32.mrf.mxu3 }
 0x4b3   : > { %v1277_v33 = vpop.f32.mrf.mxu2 }
 0x4b4   : > { %v1908_v33 = vld [vmem:[%s2374_s8 + $0x38] sm:$0xff] }
 0x4b5   : > { %1558 = vmatpush.bf16.msrb.mxu2 %v1908_v33 }
 0x4d0   : > { %v1296_v34 = vpop.f32.mrf.mxu3 }
 0x4d1   : > { %1304 = vrot.lane.b32.xlu2 %v1296_v34, %s2165_s15  ;;  %v1907_v34 = vld [vmem:[%s2374_s8 + $0x30] sm:$0xff] }
 0x4d2   : > { %1559 = vmatpush.bf16.msrb.mxu2 %v1907_v34 }
 0x4d4   : > { %v1037_v35 = vpop.permute.xlu2 %1036 }
 0x4d5   : > { %1043 = vst.msk [vmem:[#allocation4] sm:$0xff] %vm1042_vm12, %v1037_v35  ;;  %v1906_v35 = vld [vmem:[%s2374_s8 + $0x28] sm:$0xff] }
 0x4d6   : > { %1560 = vmatpush.bf16.msrb.mxu2 %v1906_v35 }
 0x4d8   : > { %v1298_v36 = vpop.f32.mrf.mxu3 }
 0x4d9   : > { %v1905_v36 = vld [vmem:[%s2374_s8 + $0x20] sm:$0xff] }
 0x4da   : > { %1561 = vmatpush.bf16.msrb.mxu2 %v1905_v36 }
 0x4e4   : > { %v1170_v37 = vpop.permute.xlu1 %1169 }
 0x4e5   : > { %1176 = vst.msk [vmem:[#allocation4] sm:$0xff] %vm1175_vm13, %v1170_v37  ;;  %v1904_v37 = vld [vmem:[%s2374_s8 + $0x18] sm:$0xff] }
 0x4e6   : > { %1562 = vmatpush.bf16.msrb.mxu2 %v1904_v37 }
 0x4e8   : > { %v1039_v38 = vpop.permute.xlu2 %1038 }
 0x4e9   : > { %1044 = vst.msk [vmem:[#allocation4 + $0x8] sm:$0xff] %vm1042_vm12, %v1039_v38  ;;  %v2003_v38 = vld [vmem:[%s663_s12] ss:$0 sm:$0xff] }
 0x505   : > { %v1172_v40 = vpop.permute.xlu2 %1171 }
 0x506   : > { %1177 = vst.msk [vmem:[#allocation4 + $0x8] sm:$0xff] %vm1175_vm13, %v1172_v40  ;;  %v1903_v40 = vld [vmem:[%s2374_s8 + $0x10] sm:$0xff] }
 0x507   : > { %1563 = vmatpush.bf16.msrb.mxu2 %v1903_v40 }
 0x51e   : > { %v1303_v41 = vpop.permute.xlu0 %1302 }
 0x51f   : > { %1309 = vst.msk [vmem:[#allocation4] sm:$0xff] %vm1308_vm14, %v1303_v41 }
 0x526   : > { %v1311_v43 = vld [vmem:[#allocation4] sm:$0xff] }
 0x52b   : > { %v1305_v42 = vpop.permute.xlu2 %1304 }
 0x52c   : > { %1310 = vst.msk [vmem:[#allocation4 + $0x8] sm:$0xff] %vm1308_vm14, %v1305_v42  ;;  %v1902_v42 = vld [vmem:[%s2374_s8 + $0x8] sm:$0xff] }
 0x52d   : > { %1564 = vmatpush.bf16.msrb.mxu2 %v1902_v42 }
 0x533   : > { %v1312_v44 = vld [vmem:[#allocation4 + $0x8] sm:$0xff] }
 0x534   : > { %v1313_v62 = vpack.c.bf16 %v1312_v44, %v1311_v43 }
 0x536   : > { %1841 = vmatmul.msk.bf16.vlgmr.msra.gmra.mxu0 %vm687_vm1, %v1313_v62  ;;  %v1901_v62 = vld [vmem:[%s2374_s8] sm:$0xff] }
 0x537   : > { %1565 = vmatpush.bf16.msrb.mxu2 %v1901_v62 }
 0x5b3   : > { %v1346_v46 = vpop.f32.mrf.mxu0 }
 0x5b4   : > { %v1347_v47 = vadd.f32 %v2000_v45, %v1346_v46 }
 0x5b6   : > { %v2536_v48 = vadd.f32 %v1347_v47, %v2379_v2 }
 0x5b8   : > { %v1355_v49 = vsel %vm687_vm1, %v2536_v48, 0.0 }
 0x5b9   : > { %1356 = vadd.xlane.f32.xlu0 %v1355_v49 }
 0x5bb   : > { %v1348_v50 = vpop.f32.mrf.mxu0 }
 0x5bc   : > { %v1349_v51 = vadd.f32 %v2000_v45, %v1348_v50 }
 0x5be   : > { %v2541_v52 = vadd.f32 %v1349_v51, %v2383_v4 }
 0x5c0   : > { %v1358_v53 = vsel %vm687_vm1, %v2541_v52, 0.0 }
 0x5c1   : > { %1359 = vadd.xlane.f32.xlu2 %v1358_v53 }
 0x62c   : > { %v1357_v54 = vpop.xlane.xlu0 %1356 }
 0x62d   : > { %v1361_v55 = vmul.f32 %v1357_v54, %v2387_v12 }
 0x62f   : > { %v1363_v2 = vsub.f32 %v2536_v48, %v1361_v55 }
 0x631   : > { %v1365_v56 = vmul.f32 %v1363_v2, %v1363_v2 }
 0x633   : > { %v1367_v57 = vsel %vm687_vm1, %v1365_v56, 0.0 }
 0x634   : > { %v1360_v58 = vpop.xlane.xlu2 %1359  ;;  %1368 = vadd.xlane.f32.xlu1 %v1367_v57 }
 0x635   : > { %v1362_v59 = vmul.f32 %v1360_v58, %v2387_v12 }
 0x637   : > { %v1364_v4 = vsub.f32 %v2541_v52, %v1362_v59 }
 0x639   : > { %v1366_v60 = vmul.f32 %v1364_v4, %v1364_v4 }
 0x63b   : > { %v1370_v61 = vsel %vm687_vm1, %v1366_v60, 0.0 }
 0x63c   : > { %1371 = vadd.xlane.f32.xlu0 %v1370_v61 }
 0x6a7   : > { %v1369_v0 = vpop.xlane.xlu1 %1368 }
 0x6a8   : > { %v1373_v1 = vmul.f32 %v1369_v0, %v2387_v12 }
 0x6aa   : > { %v1375_v6 = vadd.f32 1e-05, %v1373_v1 }
 0x6ac   : > { %2043 = vrsqrt.f32 %v1375_v6  ;;  %vm1383_vm0 = vweird.f32 %v1375_v6 }
 0x6af   : > { %v1372_v7 = vpop.xlane.xlu0 %1371 }
 0x6b0   : > { %v1374_v8 = vmul.f32 %v1372_v7, %v2387_v12  ;;  %v2001_v12 = vld [vmem:[%s2701_s18] ss:$0 sm:$0xff] }
 0x6b2   : > { %v2044_v9 = vpop.eup %2043  ;;  %v1376_v10 = vadd.f32 1e-05, %v1374_v8 }
 0x6b3   : > { %v1378_v11 = vmul.f32 %v2044_v9, %v1375_v6  ;;  %vm1384_vm15 = vweird.f32 %v2044_v9 }
 0x6b4   : > { %2045 = vrsqrt.f32 %v1376_v10  ;;  %vm1385_vm2 = vmor %vm1383_vm0, %vm1384_vm15  ;;  %vm1393_vm4 = vweird.f32 %v1376_v10 }
 0x6b5   : > { %v1379_v13 = vmul.f32 %v2044_v9, %v1378_v11 }
 0x6b7   : > { %v1380_v14 = vmul.f32 0.5, %v1379_v13 }
 0x6b9   : > { %v1381_v15 = vsub.f32 1.5, %v1380_v14 }
 0x6ba   : > { %v2046_v16 = vpop.eup %2045 }
 0x6bb   : > { %v1382_v17 = vmul.f32 %v2044_v9, %v1381_v15  ;;  %v1388_v18 = vmul.f32 %v2046_v16, %v1376_v10  ;;  %vm1394_vm3 = vweird.f32 %v2046_v16 }
 0x6bc   : > { %vm1395_vm5 = vmor %vm1393_vm4, %vm1394_vm3 }
 0x6bd   : > { %v1389_v19 = vmul.f32 %v2046_v16, %v1388_v18  ;;  %v1386_v20 = vsel %vm1385_vm2, %v2044_v9, %v1382_v17 }
 0x6be   : > { %v1397_v23 = vmul.f32 %v1386_v20, %v1363_v2 }
 0x6bf   : > { %v1390_v21 = vmul.f32 0.5, %v1389_v19 }
 0x6c0   : > { %v1402_v27 = vmul.f32 %v2001_v12, %v1397_v23 }
 0x6c1   : > { %v1391_v22 = vsub.f32 1.5, %v1390_v21 }
 0x6c2   : > { %v1407_v30 = vadd.f32 %v2002_v26, %v1402_v27 }
 0x6c3   : > { %v1392_v24 = vmul.f32 %v2046_v16, %v1391_v22 }
 0x6c5   : > { %v1396_v25 = vsel %vm1395_vm5, %v2046_v16, %v1392_v24  ;;  %v2004_v16 = vld [vmem:[%s671_s28] ss:$0 sm:$0xff] }
 0x6c6   : > { %v1398_v28 = vmul.f32 %v1396_v25, %v1364_v4 }
 0x6c8   : > { %v1403_v29 = vmul.f32 %v2001_v12, %v1398_v28 }
 0x6ca   : > { %v1408_v31 = vadd.f32 %v2002_v26, %v1403_v29 }
 0x6cc   : > { %v1409_v32 = vpack.c.bf16 %v1408_v31, %v1407_v30 }
 0x6ce   : > { %1850 = vmatmul.msk.bf16.vlgmr.msra.gmra.mxu1 %vm687_vm1, %v1409_v32 }
 0x74b   : > { %v1442_v39 = vpop.f32.mrf.mxu1 }
 0x74c   : > { %v1443_v3 = vadd.f32 %v2003_v38, %v1442_v39 }
 0x74e   : > { %v1851_v41 = vmul.f32 -1.702, %v1443_v3 }
 0x750   : > { %v1451_v43 = vmul.f32 1.442695, %v1851_v41 }
 0x752   : > { %2047 = vpow2.f32 %v1451_v43 }
 0x753   : > { %v1444_v44 = vpop.f32.mrf.mxu1 }
 0x754   : > { %v1445_v45 = vadd.f32 %v2003_v38, %v1444_v44 }
 0x756   : > { %v1852_v46 = vmul.f32 -1.702, %v1445_v45 }
 0x758   : > { %v2048_v47 = vpop.eup %2047  ;;  %v1453_v49 = vmul.f32 1.442695, %v1852_v46 }
 0x759   : > { %v1455_v50 = vadd.f32 1.0, %v2048_v47 }
 0x75a   : > { %2049 = vpow2.f32 %v1453_v49 }
 0x75b   : > { %2051 = vrcp.f32 %v1455_v50  ;;  %v1468_v4 = vand.u32 2147483648, %v1455_v50  ;;  %vm1462_vm7 = vweird.f32 %v1455_v50  ;;  %v1466_v60 = vand.u32 2147483647, %v1455_v50 }
 0x75d   : > { %v1469_v6 = vor.u32 1.1754944e-38, %v1468_v4  ;;  %vm1467_vm10 = vcmp.eq.f32.partialorder %v1466_v60, 8.507059e+37 }
 0x760   : > { %v2050_v51 = vpop.eup %2049 }
 0x761   : > { %v2052_v53 = vpop.eup %2051  ;;  %v1456_v54 = vadd.f32 1.0, %v2050_v51 }
 0x762   : > { %v1458_v55 = vmul.f32 %v2052_v53, %v1455_v50  ;;  %vm1463_vm6 = vweird.f32 %v2052_v53 }
 0x763   : > { %2053 = vrcp.f32 %v1456_v54  ;;  %vm1464_vm8 = vmor %vm1462_vm7, %vm1463_vm6  ;;  %v1483_v63 = vand.u32 2147483648, %v1456_v54  ;;  %v1481_v5 = vand.u32 2147483647, %v1456_v54  ;;  %vm1477_vm11 = vweird.f32 %v1456_v54 }
 0x764   : > { %v1459_v2 = vsub.f32 1.0, %v1458_v55 }
 0x765   : > { %v1484_v9 = vor.u32 1.1754944e-38, %v1483_v63  ;;  %vm1482_vm13 = vcmp.eq.f32.partialorder %v1481_v5, 8.507059e+37 }
 0x766   : > { %v1460_v56 = vmul.f32 %v2052_v53, %v1459_v2 }
 0x768   : > { %v1461_v58 = vadd.f32 %v2052_v53, %v1460_v56 }
 0x769   : > { %v2054_v57 = vpop.eup %2053 }
 0x76a   : > { %v1473_v59 = vmul.f32 %v2054_v57, %v1456_v54  ;;  %v1465_v0 = vsel %vm1464_vm8, %v2052_v53, %v1461_v58  ;;  %vm1478_vm9 = vweird.f32 %v2054_v57 }
 0x76b   : > { %v1470_v8 = vsel %vm1467_vm10, %v1469_v6, %v1465_v0  ;;  %vm1479_vm12 = vmor %vm1477_vm11, %vm1478_vm9 }
 0x76c   : > { %v1474_v61 = vsub.f32 1.0, %v1473_v59  ;;  %v1487_v13 = vmul.f32 %v1470_v8, %v1443_v3 }
 0x76e   : > { %v1475_v1 = vmul.f32 %v2054_v57, %v1474_v61 }
 0x770   : > { %v1476_v7 = vadd.f32 %v2054_v57, %v1475_v1 }
 0x772   : > { %v1480_v10 = vsel %vm1479_vm12, %v2054_v57, %v1476_v7 }
 0x773   : > { %v1485_v11 = vsel %vm1482_vm13, %v1484_v9, %v1480_v10 }
 0x774   : > { %v1488_v14 = vmul.f32 %v1485_v11, %v1445_v45 }
 0x776   : > { %v1489_v15 = vpack.c.bf16 %v1488_v14, %v1487_v13 }
 0x778   : > { %1566 = vmatmul.bf16.vlgmr.msrb.gmra.mxu2 %v1489_v15 }
 0x7fb   : > { %v1567_v17 = vpop.f32.mrf.mxu2 }
 0x7fc   : > { %v1568_v18 = vadd.f32 %v2004_v16, %v1567_v17 }
 0x7fe   : > { %v1572_v19 = vadd.f32 %v1568_v18, %v2536_v48 }
 0x800   : > { %1574 = vst.msk [vmem:[#allocation2] sm:$0xff] %vm687_vm1, %v1572_v19 }
 0x803   : > { %v1569_v20 = vpop.f32.mrf.mxu2 }
 0x804   : > { %v1570_v21 = vadd.f32 %v2004_v16, %v1569_v20  ;;  %1579 = sbr.rel (%p1885_p1) target bundleno = 2059 (0x80b), region = 84 }
 0x806   : > { %v1573_v22 = vadd.f32 %v1570_v21, %v2541_v52 }
 0x808   : > { %1575 = vst.msk [vmem:[#allocation2 + $0x8] sm:$0xff] %vm687_vm1, %v1573_v22 }
 0x809   : > { %1580 = vst.msk [vmem:[%s2376_s29] sm:$0xff] %vm687_vm1, %v1572_v19 }
 0x80a   : > { %1581 = vst.msk [vmem:[%s2376_s29 + $0x8] sm:$0xff] %vm687_vm1, %v1573_v22 }
 0x80b PF: > { %s2703_s16 = sld [smem:[#allocation12_spill]]  ;;  %s1595_s17 = sshll.u32 %s2376_s29, 4  ;;  %s1596_s17 = int_to_ptr.vmem [resolvable:$true] %s1595_s17 }
 0x80c   : > { %s2704_s28 = sld [smem:[#allocation9_spill]] }
 0x80d   : > { %s2706_s15 = sld [smem:[#allocation26_spill]] }
 0x811   : > { %s1909_s30 = sshll.u32 %s2703_s16, 4 }
 0x812   : > { %s2708_s20 = sand.u32 1, %s2704_s28  }
 0x813   : > { %s2707_s22 = smov %s2706_s15  ;;  %s1594_s25 = scalar_lea.hbm %s2706_s15, %s1909_s30 }
 0x814   : > { %s1597_s26 = sshll.u32 %s1594_s25, 4  ;;  %s1583_s27 = scalar_lea.sflag [#allocation6], %s2708_s20  ;;  %s1598_s26 = int_to_ptr.hbm [resolvable:$true] %s1597_s26 }
 0x815   : > { %s2069_s18 = sshra.s32 %s1598_s26, 4  ;;  %s2075_s4 = scalar_lea.hbm %s2707_s22, 32  ;;  %s2070_s18 = int_to_ptr.hbm [resolvable:$true] %s2069_s18 }
 0x816   : > { %s2071_s24 = scalar_lea.hbm %s2070_s18, 16  ;;  %p2076_p6 = scmp.lt.s32.totalorder %s2070_s18, %s2707_s22 }
 0x817   : > { %p2072_p2 = scmp.ne.s32.totalorder %s2070_s18, %s2071_s24  ;;  %p2077_p7 = scmp.lt.s32.totalorder %s2075_s4, %s2071_s24 }
 0x819   : > { %p2073_p4 = pnand %p2072_p2, %p2291_p3  ;;  %p2078_p8 = por %p2077_p7, %p2076_p6 }
 0x81b   : > { %p2074_p5 = pneg %p2073_p4 }
 0x81d   : > { %p2079_p10 = pnand %p2078_p8, %p2074_p5 }
 0x81f   : > { %2082 = shalt.err (!%p2079_p10)
}
 0x820   : > { %s2166_s29 = smov 128  }
 0x821   : > { %1910 = dma.vmem_to_hbm [thread:$0]  (%p2291_p3), %s1596_s17, 256, %s1598_s26, %s1583_s27, %s2166_s29, %s2166_s29, %s2164_s19  }
 0x822 PF: > { %s2709_s6 = sld [smem:[#allocation15_spill]] }
 0x823   : > { %s2710_s16 = sld [smem:[#allocation8_spill]] }
 0x828   : > { %p1916_p11 = scmp.ge.s32.totalorder %s2709_s6, 2 }
 0x829   : > { %s1612_s30 = sand.u32 1, %s2710_s16  }
 0x82a   : > { %p1913_p12 = pnand %p1916_p11, %p2301_p9  ;;  %s1613_s1 = scalar_lea.sflag [#allocation6], %s1612_s30 }
 0x82c   : > { %p1914_p13 = pneg %p1913_p12 }
 0x82e   : > { %2116 = dma.done.wait (%p1914_p13), %s1613_s1, 256  }
 0x82f   : > { %2118 = vsyncadd (%p1914_p13), %s1613_s1, 4294967040  ;;  %s27_s18 = sadd.s32 1, %s2709_s6   ;;  %s2712_s28 = sld [smem:[#allocation9_spill]] }
 0x830   : > { %p24_p0 = scmp.ge.s32.totalorder %s27_s18, 6   ;;  %s2713_s29 = sld [smem:[#allocation10_spill]] }
 0x831   : > { %s2714_s30 = sld [smem:[#allocation20_spill]] }
 0x832   : > { %s2715_s15 = sld [smem:[#allocation13_spill]]  ;;  %26 = sbr.rel (!%p24_p0) target bundleno = 12 (0xc), region = 155 }
 0x833   : > { %s2716_s1 = sld [smem:[#allocation14_spill]] }
 0x834   : > { %s2717_s16 = sld [smem:[#allocation16_spill]] }
 0x835   : > { %s2718_s17 = sld [smem:[#allocation18_spill]] }
 0x837   :  { %1619 = vsyncpa [#allocation6], 1 }
 0x838   :  { %1621 = vsyncpa [#allocation6 + $0x1], 1 }

</bundles_post_ra>
